<compile_context>
chip_gen: v6e
topology: v6e:2x2x1
jax: 0.10.0
libtpu: 0.0.40
codegen_flags: <defaults>
</compile_context>

<pallas_src>
import functools

import jax
import jax.numpy as jnp
from jax.experimental import pallas as pl
from jax.experimental.pallas import tpu as pltpu
from jax.scipy.linalg import block_diag

# ---------------- model hyper-parameters (small, consistent with the module) -------------
NUM_NODES = 16
IN_CHANNELS = 8
HIDDEN_CHANNELS = 32          # 4*H == 128 -> gate matmul output is exactly one lane tile
OUT_CHANNELS = 8
NUM_LAYERS = 3
BATCH = 4                     # graphs; all stacked into one grid step


# ------------------------------------ kernel ---------------------------------------------
def _gated_gcn_kernel(
    num_layers, hidden,
    # inputs (per grid step: stacked graphs' x/adj + resident weights)
    x_ref,          # (S, Cin)   f32, S = graphs_per_step * N
    adj_ref,        # (S, S)     bf16 block-diagonal, adj[dst, src]
    w_in_ref,       # (Cin, H)   bf16
    wl_gates_ref,   # (L, H, 4H) bf16   wl_gates[l] = w_layers[l] @ [W_ir | W_iz | W_inn | 0]
    w_h_gates_ref,  # (H, 4H)    bf16   [W_hr | W_hz | 0 | W_hn]
    w_out_ref,      # (H, Cout)  bf16
    biases_ref,     # (2, 4H)    f32    row0 = [b_ir+b_hr | b_iz+b_hz | b_inn | b_hn]
                    #                   row1 = [b_in (H) | b_out (Cout) | zeros]
    # output
    o_ref,          # (S, Cout)  f32
):
    H = hidden
    bf16 = jnp.bfloat16
    x = x_ref[...]
    adj = adj_ref[...]
    s_nodes = x.shape[0]
    cout = o_ref.shape[-1]

    # Biases (tiny, f32).  Pre-broadcast the fused gate bias once.
    biases = biases_ref[...]
    b_gates = jnp.broadcast_to(biases[0:1, :], (s_nodes, 4 * H))
    b_in = biases[1:2, 0:H]

    # dropout (eval mode) -> identity; input_proj
    h = jnp.dot(x.astype(bf16), w_in_ref[...], preferred_element_type=jnp.float32) + b_in

    # GatedGraphConv: m = A @ (h W_l); h = GRUCell(m, h)   (refolded: m @ W_i == (A h) wl_gates)
    w_h_gates = w_h_gates_ref[...]
    for l in range(num_layers):
        hb = h.astype(bf16)
        ah = jnp.dot(adj, hb, preferred_element_type=jnp.float32)          # scatter-add agg
        g = (jnp.dot(ah.astype(bf16), wl_gates_ref[l],
                     preferred_element_type=jnp.float32)
             + jnp.dot(hb, w_h_gates, preferred_element_type=jnp.float32)
             + b_gates)                                                      # (S, 128)

        rz = jax.nn.sigmoid(g[:, 0:2 * H])                                   # one EUP call
        r = rz[:, 0:H]
        z = rz[:, H:2 * H]
        n = jnp.tanh(g[:, 2 * H:3 * H] + r * g[:, 3 * H:4 * H])              # W_in m + b + r*(W_hn h + b)
        h = (1.0 - z) * n + z * h

    # ReLU, dropout (identity), output_proj
    h = jnp.maximum(h, 0.0)
    b_out = biases[1:2, H:H + cout]
    logits = jnp.dot(h.astype(bf16), w_out_ref[...],
                     preferred_element_type=jnp.float32) + b_out

    # log_softmax along channel dim
    mx = jnp.max(logits, axis=1, keepdims=True)
    shifted = logits - mx
    lse = jnp.log(jnp.sum(jnp.exp(shifted), axis=1, keepdims=True))
    o_ref[...] = shifted - lse


# ------------------------------------ wrapper --------------------------------------------
def gated_gcn_forward(x, adj, packed, grid_steps=1):
    """x: (B, N, Cin), adj: (B, N, N) with adj[dst, src]; packed: packed parameter slabs.

    grid_steps=1 for v5e/v6e (single TensorCore); grid_steps=2 on v7x to shard across cores.
    """
    B, N, Cin = x.shape
    L, H, _ = packed["wl_gates"].shape
    Cout = packed["w_out"].shape[1]
    G = grid_steps
    assert B % G == 0
    Bg = B // G
    S = Bg * N

    wdtype = packed["w_h_gates"].dtype
    # Stack graphs along the node axis; block-diagonal adjacency per grid step (plain XLA).
    x_s = x.reshape(G, S, Cin)
    adj_g = adj.reshape(G, Bg, N, N).astype(wdtype)
    adj_s = jnp.stack([block_diag(*[adj_g[g, i] for i in range(Bg)]) for g in range(G)])

    def resident(shape):
        nd = len(shape)
        return pl.BlockSpec(shape, lambda g: (0,) * nd)

    in_specs = [
        pl.BlockSpec((None, S, Cin), lambda g: (g, 0, 0)),   # x  (per-step block)
        pl.BlockSpec((None, S, S), lambda g: (g, 0, 0)),     # adj (per-step block)
        resident(packed["w_in"].shape),
        resident(packed["wl_gates"].shape),
        resident(packed["w_h_gates"].shape),
        resident(packed["w_out"].shape),
        resident(packed["biases"].shape),
    ]
    out_spec = pl.BlockSpec((None, S, Cout), lambda g: (g, 0, 0))
    out_shape = jax.ShapeDtypeStruct((G, S, Cout), jnp.float32)

    kernel = functools.partial(_gated_gcn_kernel, L, H)
    out = pl.pallas_call(
        kernel,
        grid=(G,),
        in_specs=in_specs,
        out_specs=out_spec,
        out_shape=out_shape,
        compiler_params=pltpu.CompilerParams(
            dimension_semantics=("parallel",),   # no-op at G=1; shards cores on v7x at G=2
            vmem_limit_bytes=4 << 20,
        ),
    )(x_s, adj_s, packed["w_in"], packed["wl_gates"], packed["w_h_gates"],
      packed["w_out"], packed["biases"])
    return out.reshape(B, N, Cout)


# ------------------------------------ params ---------------------------------------------
def init_params(key):
    """Per-gate parameters matching a PyTorch GRUCell (pre-transposed for x @ W)."""
    ks = jax.random.split(key, 16)
    f32 = jnp.float32
    H, Cin, Cout, L = HIDDEN_CHANNELS, IN_CHANNELS, OUT_CHANNELS, NUM_LAYERS
    s = 0.1
    return {
        "w_in": (jax.random.normal(ks[0], (Cin, H)) * s).astype(f32),
        "b_in": (jax.random.normal(ks[1], (1, H)) * s).astype(f32),
        "w_layers": (jax.random.normal(ks[2], (L, H, H)) * s).astype(f32),
        "w_ir": (jax.random.normal(ks[3], (H, H)) * s).astype(f32),
        "w_iz": (jax.random.normal(ks[4], (H, H)) * s).astype(f32),
        "w_inn": (jax.random.normal(ks[5], (H, H)) * s).astype(f32),
        "w_hr": (jax.random.normal(ks[6], (H, H)) * s).astype(f32),
        "w_hz": (jax.random.normal(ks[7], (H, H)) * s).astype(f32),
        "w_hn": (jax.random.normal(ks[8], (H, H)) * s).astype(f32),
        "b_ir": (jax.random.normal(ks[9], (1, H)) * s).astype(f32),
        "b_iz": (jax.random.normal(ks[10], (1, H)) * s).astype(f32),
        "b_inn": (jax.random.normal(ks[11], (1, H)) * s).astype(f32),
        "b_hr": (jax.random.normal(ks[12], (1, H)) * s).astype(f32),
        "b_hz": (jax.random.normal(ks[13], (1, H)) * s).astype(f32),
        "b_hn": (jax.random.normal(ks[14], (1, H)) * s).astype(f32),
        "w_out": (jax.random.normal(ks[15], (H, Cout)) * s).astype(f32),
        "b_out": jnp.zeros((1, Cout), f32),
    }


def pack_params(p):
    """Pack per-gate params into the fused/refolded kernel layout (weights in bf16)."""
    H, Cout = HIDDEN_CHANNELS, OUT_CHANNELS
    f32 = jnp.float32
    bf16 = jnp.bfloat16

    # Input-side gate slab (H, 4H): [W_ir | W_iz | W_inn | 0]
    w_i_gates = jnp.zeros((H, 4 * H), f32)
    w_i_gates = w_i_gates.at[:, 0:H].set(p["w_ir"])
    w_i_gates = w_i_gates.at[:, H:2 * H].set(p["w_iz"])
    w_i_gates = w_i_gates.at[:, 2 * H:3 * H].set(p["w_inn"])

    # Hidden-side gate slab (H, 4H): [W_hr | W_hz | 0 | W_hn]
    w_h_gates = jnp.zeros((H, 4 * H), f32)
    w_h_gates = w_h_gates.at[:, 0:H].set(p["w_hr"])
    w_h_gates = w_h_gates.at[:, H:2 * H].set(p["w_hz"])
    w_h_gates = w_h_gates.at[:, 3 * H:4 * H].set(p["w_hn"])

    # Algebraic refold: (adj @ (h @ wl)) @ W_i == (adj @ h) @ (wl @ W_i)
    wl_gates = jnp.einsum("lhk,kg->lhg", p["w_layers"], w_i_gates)   # (L, H, 4H)

    b_gates = jnp.concatenate(
        [p["b_ir"] + p["b_hr"], p["b_iz"] + p["b_hz"], p["b_inn"], p["b_hn"]], axis=1)  # (1, 4H)
    b_misc = jnp.zeros((1, 4 * H), f32)
    b_misc = b_misc.at[:, 0:H].set(p["b_in"])
    b_misc = b_misc.at[:, H:H + Cout].set(p["b_out"])
    biases = jnp.concatenate([b_gates, b_misc], axis=0)                                  # (2, 4H)

    return {
        "w_in": p["w_in"].astype(bf16),
        "wl_gates": wl_gates.astype(bf16),
        "w_h_gates": w_h_gates.astype(bf16),
        "w_out": p["w_out"].astype(bf16),
        "biases": biases,          # f32 (added to f32 accumulators)
    }


# ------------------------------------ graph helpers & reference --------------------------
def build_edge_index(num_nodes, offset=1):
    # deterministic directed ring (stride=offset) in both directions, PyG convention
    src = jnp.arange(num_nodes, dtype=jnp.int32)
    dst = (src + offset) % num_nodes
    return jnp.stack(
        [jnp.concatenate([src, dst]), jnp.concatenate([dst, src])], axis=0)  # row0=src, row1=dst


def edge_index_to_adj(edge_index, num_nodes):
    # adj[dst, src] += 1  => (adj @ m)[i] = sum over edges (j -> i) of m[j]   (aggr='add')
    src, dst = edge_index[0], edge_index[1]
    adj = jnp.zeros((num_nodes, num_nodes), jnp.float32)
    return adj.at[dst, src].add(1.0)


def gated_gcn_reference(x, adj, p):
    # pure-JAX f32 reference with the unfused per-gate parameters (PyTorch GRUCell formulas)
    h = x @ p["w_in"] + p["b_in"]
    for l in range(NUM_LAYERS):
        m = adj @ (h @ p["w_layers"][l])
        r = jax.nn.sigmoid(m @ p["w_ir"] + p["b_ir"] + h @ p["w_hr"] + p["b_hr"])
        z = jax.nn.sigmoid(m @ p["w_iz"] + p["b_iz"] + h @ p["w_hz"] + p["b_hz"])
        n = jnp.tanh(m @ p["w_inn"] + p["b_inn"] + r * (h @ p["w_hn"] + p["b_hn"]))
        h = (1.0 - z) * n + z * h
    h = jnp.maximum(h, 0.0)
    logits = h @ p["w_out"] + p["b_out"]
    return jax.nn.log_softmax(logits, axis=-1)


# ------------------------------------ main ------------------------------------------------
if __name__ == "__main__":
    key = jax.random.PRNGKey(0)
    k_x, k_p = jax.random.split(key)

    x = jax.random.normal(k_x, (BATCH, NUM_NODES, IN_CHANNELS), dtype=jnp.float32)
    adj = jnp.stack([
        edge_index_to_adj(build_edge_index(NUM_NODES, offset=b + 1), NUM_NODES)
        for b in range(BATCH)
    ])

    raw_params = init_params(k_p)
    packed = pack_params(raw_params)

    out = gated_gcn_forward(x, adj, packed, grid_steps=1)  # grid_steps=2 for v7x megacore
    out = jax.block_until_ready(out)

    assert out.shape == (BATCH, NUM_NODES, OUT_CHANNELS)
    # log_softmax rows exponentiate-sum to 1
    assert jnp.allclose(jnp.sum(jnp.exp(out), axis=-1), 1.0, atol=1e-4)
    # match the unfused pure-f32 reference (tolerance loosened for bf16 weights/activations)
    ref = jax.vmap(lambda xb, ab: gated_gcn_reference(xb, ab, raw_params))(x, adj)
    assert jnp.allclose(out, ref, atol=3e-2, rtol=3e-2)
    print("KERNEL_OK")
</pallas_src>

<mosaic_0001>
module attributes {stable_mosaic.version = 11 : i64} {
  func.func @_gated_gcn_kernel(%arg0: i32, %arg1: memref<1x64x8xf32, #tpu.memory_space<vmem>>, %arg2: memref<1x64x64xbf16, #tpu.memory_space<vmem>>, %arg3: memref<8x32xbf16, #tpu.memory_space<vmem>>, %arg4: memref<3x32x128xbf16, #tpu.memory_space<vmem>>, %arg5: memref<32x128xbf16, #tpu.memory_space<vmem>>, %arg6: memref<32x8xbf16, #tpu.memory_space<vmem>>, %arg7: memref<2x128xf32, #tpu.memory_space<vmem>>, %arg8: memref<1x64x8xf32, #tpu.memory_space<vmem>>) attributes {dimension_semantics = [#tpu.dimension_semantics<parallel>], iteration_bounds = array<i64: 1>, scalar_prefetch = 0 : i64, scratch_operands = 0 : i64, tpu.core_type = #tpu.core_type<tc>, window_params = [{transform_indices = @transform_0, window_bounds = array<i64: 1, 64, 8>}, {transform_indices = @transform_1, window_bounds = array<i64: 1, 64, 64>}, {pipeline_mode = #tpu.pipeline_mode<synchronous>, transform_indices = @transform_2, window_bounds = array<i64: 8, 32>}, {pipeline_mode = #tpu.pipeline_mode<synchronous>, transform_indices = @transform_3, window_bounds = array<i64: 3, 32, 128>}, {pipeline_mode = #tpu.pipeline_mode<synchronous>, transform_indices = @transform_4, window_bounds = array<i64: 32, 128>}, {pipeline_mode = #tpu.pipeline_mode<synchronous>, transform_indices = @transform_5, window_bounds = array<i64: 32, 8>}, {pipeline_mode = #tpu.pipeline_mode<synchronous>, transform_indices = @transform_6, window_bounds = array<i64: 2, 128>}, {transform_indices = @transform_7, window_bounds = array<i64: 1, 64, 8>}]} {
    %c0 = arith.constant 0 : index
    %c0_0 = arith.constant 0 : index
    %c0_1 = arith.constant 0 : index
    %0 = vector.load %arg1[%c0, %c0_0, %c0_1] : memref<1x64x8xf32, #tpu.memory_space<vmem>>, vector<1x64x8xf32>
    %1 = vector.shape_cast %0 : vector<1x64x8xf32> to vector<64x8xf32>
    %c0_2 = arith.constant 0 : index
    %c0_3 = arith.constant 0 : index
    %c0_4 = arith.constant 0 : index
    %2 = vector.load %arg2[%c0_2, %c0_3, %c0_4] : memref<1x64x64xbf16, #tpu.memory_space<vmem>>, vector<1x64x64xbf16>
    %3 = vector.shape_cast %2 : vector<1x64x64xbf16> to vector<64x64xbf16>
    %c0_5 = arith.constant 0 : index
    %c0_6 = arith.constant 0 : index
    %4 = vector.load %arg7[%c0_5, %c0_6] : memref<2x128xf32, #tpu.memory_space<vmem>>, vector<2x128xf32>
    %5 = vector.extract_strided_slice %4 {offsets = [0, 0], sizes = [1, 128], strides = [1, 1]} : vector<2x128xf32> to vector<1x128xf32>
    %6 = vector.shape_cast %5 : vector<1x128xf32> to vector<1x128xf32>
    %7 = vector.broadcast %6 : vector<1x128xf32> to vector<64x128xf32>
    %8 = vector.extract_strided_slice %4 {offsets = [1, 0], sizes = [1, 32], strides = [1, 1]} : vector<2x128xf32> to vector<1x32xf32>
    %9 = arith.truncf %1 : vector<64x8xf32> to vector<64x8xbf16>
    %c0_7 = arith.constant 0 : index
    %c0_8 = arith.constant 0 : index
    %10 = vector.load %arg3[%c0_7, %c0_8] : memref<8x32xbf16, #tpu.memory_space<vmem>>, vector<8x32xbf16>
    %cst = arith.constant dense<0.000000e+00> : vector<64x32xf32>
    %11 = tpu.matmul %9, %10, %cst {dimension_numbers = #tpu.dot_dimension_numbers<[1], [0], [0], [1], [0, 0, 1, 1], [], []>} : vector<64x8xbf16>, vector<8x32xbf16>, vector<64x32xf32> -> vector<64x32xf32>
    %12 = vector.broadcast %8 : vector<1x32xf32> to vector<64x32xf32>
    %13 = arith.addf %11, %12 : vector<64x32xf32>
    %c0_9 = arith.constant 0 : index
    %c0_10 = arith.constant 0 : index
    %14 = vector.load %arg5[%c0_9, %c0_10] : memref<32x128xbf16, #tpu.memory_space<vmem>>, vector<32x128xbf16>
    %15 = arith.truncf %13 : vector<64x32xf32> to vector<64x32xbf16>
    %cst_11 = arith.constant dense<0.000000e+00> : vector<64x32xf32>
    %16 = tpu.matmul %3, %15, %cst_11 {dimension_numbers = #tpu.dot_dimension_numbers<[1], [0], [0], [1], [0, 0, 1, 1], [], []>} : vector<64x64xbf16>, vector<64x32xbf16>, vector<64x32xf32> -> vector<64x32xf32>
    %17 = arith.truncf %16 : vector<64x32xf32> to vector<64x32xbf16>
    %c0_12 = arith.constant 0 : index
    %c0_13 = arith.constant 0 : index
    %c0_14 = arith.constant 0 : index
    %18 = vector.load %arg4[%c0_12, %c0_13, %c0_14] : memref<3x32x128xbf16, #tpu.memory_space<vmem>>, vector<1x32x128xbf16>
    %19 = vector.shape_cast %18 : vector<1x32x128xbf16> to vector<32x128xbf16>
    %cst_15 = arith.constant dense<0.000000e+00> : vector<64x128xf32>
    %20 = tpu.matmul %17, %19, %cst_15 {dimension_numbers = #tpu.dot_dimension_numbers<[1], [0], [0], [1], [0, 0, 1, 1], [], []>} : vector<64x32xbf16>, vector<32x128xbf16>, vector<64x128xf32> -> vector<64x128xf32>
    %cst_16 = arith.constant dense<0.000000e+00> : vector<64x128xf32>
    %21 = tpu.matmul %15, %14, %cst_16 {dimension_numbers = #tpu.dot_dimension_numbers<[1], [0], [0], [1], [0, 0, 1, 1], [], []>} : vector<64x32xbf16>, vector<32x128xbf16>, vector<64x128xf32> -> vector<64x128xf32>
    %22 = arith.addf %20, %21 : vector<64x128xf32>
    %23 = arith.addf %22, %7 : vector<64x128xf32>
    %24 = vector.extract_strided_slice %23 {offsets = [0, 0], sizes = [64, 64], strides = [1, 1]} : vector<64x128xf32> to vector<64x64xf32>
    %25 = arith.negf %24 : vector<64x64xf32>
    %26 = math.exp %25 : vector<64x64xf32>
    %cst_17 = arith.constant 1.000000e+00 : f32
    %27 = vector.broadcast %cst_17 : f32 to vector<64x64xf32>
    %28 = arith.addf %27, %26 : vector<64x64xf32>
    %29 = arith.divf %27, %28 : vector<64x64xf32>
    %30 = vector.extract_strided_slice %29 {offsets = [0, 0], sizes = [64, 32], strides = [1, 1]} : vector<64x64xf32> to vector<64x32xf32>
    %31 = vector.extract_strided_slice %29 {offsets = [0, 32], sizes = [64, 32], strides = [1, 1]} : vector<64x64xf32> to vector<64x32xf32>
    %32 = vector.extract_strided_slice %23 {offsets = [0, 64], sizes = [64, 32], strides = [1, 1]} : vector<64x128xf32> to vector<64x32xf32>
    %33 = vector.extract_strided_slice %23 {offsets = [0, 96], sizes = [64, 32], strides = [1, 1]} : vector<64x128xf32> to vector<64x32xf32>
    %34 = arith.mulf %30, %33 : vector<64x32xf32>
    %35 = arith.addf %32, %34 : vector<64x32xf32>
    %36 = math.tanh %35 : vector<64x32xf32>
    %cst_18 = arith.constant 1.000000e+00 : f32
    %37 = vector.broadcast %cst_18 : f32 to vector<64x32xf32>
    %38 = arith.subf %37, %31 : vector<64x32xf32>
    %39 = arith.mulf %38, %36 : vector<64x32xf32>
    %40 = arith.mulf %31, %13 : vector<64x32xf32>
    %41 = arith.addf %39, %40 : vector<64x32xf32>
    %42 = arith.truncf %41 : vector<64x32xf32> to vector<64x32xbf16>
    %cst_19 = arith.constant dense<0.000000e+00> : vector<64x32xf32>
    %43 = tpu.matmul %3, %42, %cst_19 {dimension_numbers = #tpu.dot_dimension_numbers<[1], [0], [0], [1], [0, 0, 1, 1], [], []>} : vector<64x64xbf16>, vector<64x32xbf16>, vector<64x32xf32> -> vector<64x32xf32>
    %44 = arith.truncf %43 : vector<64x32xf32> to vector<64x32xbf16>
    %c1 = arith.constant 1 : index
    %c0_20 = arith.constant 0 : index
    %c0_21 = arith.constant 0 : index
    %45 = vector.load %arg4[%c1, %c0_20, %c0_21] : memref<3x32x128xbf16, #tpu.memory_space<vmem>>, vector<1x32x128xbf16>
    %46 = vector.shape_cast %45 : vector<1x32x128xbf16> to vector<32x128xbf16>
    %cst_22 = arith.constant dense<0.000000e+00> : vector<64x128xf32>
    %47 = tpu.matmul %44, %46, %cst_22 {dimension_numbers = #tpu.dot_dimension_numbers<[1], [0], [0], [1], [0, 0, 1, 1], [], []>} : vector<64x32xbf16>, vector<32x128xbf16>, vector<64x128xf32> -> vector<64x128xf32>
    %cst_23 = arith.constant dense<0.000000e+00> : vector<64x128xf32>
    %48 = tpu.matmul %42, %14, %cst_23 {dimension_numbers = #tpu.dot_dimension_numbers<[1], [0], [0], [1], [0, 0, 1, 1], [], []>} : vector<64x32xbf16>, vector<32x128xbf16>, vector<64x128xf32> -> vector<64x128xf32>
    %49 = arith.addf %47, %48 : vector<64x128xf32>
    %50 = arith.addf %49, %7 : vector<64x128xf32>
    %51 = vector.extract_strided_slice %50 {offsets = [0, 0], sizes = [64, 64], strides = [1, 1]} : vector<64x128xf32> to vector<64x64xf32>
    %52 = arith.negf %51 : vector<64x64xf32>
    %53 = math.exp %52 : vector<64x64xf32>
    %cst_24 = arith.constant 1.000000e+00 : f32
    %54 = vector.broadcast %cst_24 : f32 to vector<64x64xf32>
    %55 = arith.addf %54, %53 : vector<64x64xf32>
    %56 = arith.divf %54, %55 : vector<64x64xf32>
    %57 = vector.extract_strided_slice %56 {offsets = [0, 0], sizes = [64, 32], strides = [1, 1]} : vector<64x64xf32> to vector<64x32xf32>
    %58 = vector.extract_strided_slice %56 {offsets = [0, 32], sizes = [64, 32], strides = [1, 1]} : vector<64x64xf32> to vector<64x32xf32>
    %59 = vector.extract_strided_slice %50 {offsets = [0, 64], sizes = [64, 32], strides = [1, 1]} : vector<64x128xf32> to vector<64x32xf32>
    %60 = vector.extract_strided_slice %50 {offsets = [0, 96], sizes = [64, 32], strides = [1, 1]} : vector<64x128xf32> to vector<64x32xf32>
    %61 = arith.mulf %57, %60 : vector<64x32xf32>
    %62 = arith.addf %59, %61 : vector<64x32xf32>
    %63 = math.tanh %62 : vector<64x32xf32>
    %cst_25 = arith.constant 1.000000e+00 : f32
    %64 = vector.broadcast %cst_25 : f32 to vector<64x32xf32>
    %65 = arith.subf %64, %58 : vector<64x32xf32>
    %66 = arith.mulf %65, %63 : vector<64x32xf32>
    %67 = arith.mulf %58, %41 : vector<64x32xf32>
    %68 = arith.addf %66, %67 : vector<64x32xf32>
    %69 = arith.truncf %68 : vector<64x32xf32> to vector<64x32xbf16>
    %cst_26 = arith.constant dense<0.000000e+00> : vector<64x32xf32>
    %70 = tpu.matmul %3, %69, %cst_26 {dimension_numbers = #tpu.dot_dimension_numbers<[1], [0], [0], [1], [0, 0, 1, 1], [], []>} : vector<64x64xbf16>, vector<64x32xbf16>, vector<64x32xf32> -> vector<64x32xf32>
    %71 = arith.truncf %70 : vector<64x32xf32> to vector<64x32xbf16>
    %c2 = arith.constant 2 : index
    %c0_27 = arith.constant 0 : index
    %c0_28 = arith.constant 0 : index
    %72 = vector.load %arg4[%c2, %c0_27, %c0_28] : memref<3x32x128xbf16, #tpu.memory_space<vmem>>, vector<1x32x128xbf16>
    %73 = vector.shape_cast %72 : vector<1x32x128xbf16> to vector<32x128xbf16>
    %cst_29 = arith.constant dense<0.000000e+00> : vector<64x128xf32>
    %74 = tpu.matmul %71, %73, %cst_29 {dimension_numbers = #tpu.dot_dimension_numbers<[1], [0], [0], [1], [0, 0, 1, 1], [], []>} : vector<64x32xbf16>, vector<32x128xbf16>, vector<64x128xf32> -> vector<64x128xf32>
    %cst_30 = arith.constant dense<0.000000e+00> : vector<64x128xf32>
    %75 = tpu.matmul %69, %14, %cst_30 {dimension_numbers = #tpu.dot_dimension_numbers<[1], [0], [0], [1], [0, 0, 1, 1], [], []>} : vector<64x32xbf16>, vector<32x128xbf16>, vector<64x128xf32> -> vector<64x128xf32>
    %76 = arith.addf %74, %75 : vector<64x128xf32>
    %77 = arith.addf %76, %7 : vector<64x128xf32>
    %78 = vector.extract_strided_slice %77 {offsets = [0, 0], sizes = [64, 64], strides = [1, 1]} : vector<64x128xf32> to vector<64x64xf32>
    %79 = arith.negf %78 : vector<64x64xf32>
    %80 = math.exp %79 : vector<64x64xf32>
    %cst_31 = arith.constant 1.000000e+00 : f32
    %81 = vector.broadcast %cst_31 : f32 to vector<64x64xf32>
    %82 = arith.addf %81, %80 : vector<64x64xf32>
    %83 = arith.divf %81, %82 : vector<64x64xf32>
    %84 = vector.extract_strided_slice %83 {offsets = [0, 0], sizes = [64, 32], strides = [1, 1]} : vector<64x64xf32> to vector<64x32xf32>
    %85 = vector.extract_strided_slice %83 {offsets = [0, 32], sizes = [64, 32], strides = [1, 1]} : vector<64x64xf32> to vector<64x32xf32>
    %86 = vector.extract_strided_slice %77 {offsets = [0, 64], sizes = [64, 32], strides = [1, 1]} : vector<64x128xf32> to vector<64x32xf32>
    %87 = vector.extract_strided_slice %77 {offsets = [0, 96], sizes = [64, 32], strides = [1, 1]} : vector<64x128xf32> to vector<64x32xf32>
    %88 = arith.mulf %84, %87 : vector<64x32xf32>
    %89 = arith.addf %86, %88 : vector<64x32xf32>
    %90 = math.tanh %89 : vector<64x32xf32>
    %cst_32 = arith.constant 1.000000e+00 : f32
    %91 = vector.broadcast %cst_32 : f32 to vector<64x32xf32>
    %92 = arith.subf %91, %85 : vector<64x32xf32>
    %93 = arith.mulf %92, %90 : vector<64x32xf32>
    %94 = arith.mulf %85, %68 : vector<64x32xf32>
    %95 = arith.addf %93, %94 : vector<64x32xf32>
    %cst_33 = arith.constant 0.000000e+00 : f32
    %96 = vector.broadcast %cst_33 : f32 to vector<64x32xf32>
    %97 = arith.maximumf %95, %96 : vector<64x32xf32>
    %98 = vector.extract_strided_slice %4 {offsets = [1, 32], sizes = [1, 8], strides = [1, 1]} : vector<2x128xf32> to vector<1x8xf32>
    %99 = arith.truncf %97 : vector<64x32xf32> to vector<64x32xbf16>
    %c0_34 = arith.constant 0 : index
    %c0_35 = arith.constant 0 : index
    %100 = vector.load %arg6[%c0_34, %c0_35] : memref<32x8xbf16, #tpu.memory_space<vmem>>, vector<32x8xbf16>
    %cst_36 = arith.constant dense<0.000000e+00> : vector<64x8xf32>
    %101 = tpu.matmul %99, %100, %cst_36 {dimension_numbers = #tpu.dot_dimension_numbers<[1], [0], [0], [1], [0, 0, 1, 1], [], []>} : vector<64x32xbf16>, vector<32x8xbf16>, vector<64x8xf32> -> vector<64x8xf32>
    %102 = vector.broadcast %98 : vector<1x8xf32> to vector<64x8xf32>
    %103 = arith.addf %101, %102 : vector<64x8xf32>
    %cst_37 = arith.constant dense<0xFF800000> : vector<64xf32>
    %104 = vector.multi_reduction <maximumf>, %103, %cst_37 [1] : vector<64x8xf32> to vector<64xf32>
    %105 = vector.shape_cast %104 : vector<64xf32> to vector<64x1xf32>
    %106 = vector.broadcast %105 : vector<64x1xf32> to vector<64x8xf32>
    %107 = arith.subf %103, %106 : vector<64x8xf32>
    %108 = math.exp %107 : vector<64x8xf32>
    %cst_38 = arith.constant dense<0.000000e+00> : vector<64xf32>
    %109 = vector.multi_reduction <add>, %108, %cst_38 [1] : vector<64x8xf32> to vector<64xf32>
    %110 = vector.shape_cast %109 : vector<64xf32> to vector<64x1xf32>
    %111 = math.log %110 : vector<64x1xf32>
    %112 = vector.broadcast %111 : vector<64x1xf32> to vector<64x8xf32>
    %113 = arith.subf %107, %112 : vector<64x8xf32>
    %c0_39 = arith.constant 0 : index
    %c0_40 = arith.constant 0 : index
    %c0_41 = arith.constant 0 : index
    %114 = vector.load %arg8[%c0_39, %c0_40, %c0_41] : memref<1x64x8xf32, #tpu.memory_space<vmem>>, vector<1x64x8xf32>
    %115 = vector.shape_cast %114 : vector<1x64x8xf32> to vector<64x8xf32>
    %116 = vector.shape_cast %113 : vector<64x8xf32> to vector<1x64x8xf32>
    tpu.vector_store %arg8[%c0_39, %c0_40, %c0_41], %116 {strides = array<i32>} : memref<1x64x8xf32, #tpu.memory_space<vmem>>, vector<1x64x8xf32>,
    return
  }
  func.func @transform_0(%arg0: i32) -> (i32, i32, i32) {
    %c0_i32 = arith.constant 0 : i32
    %c0_i32_0 = arith.constant 0 : i32
    %c0_i32_1 = arith.constant 0 : i32
    return %arg0, %c0_i32, %c0_i32_0 : i32, i32, i32
  }
  func.func @transform_1(%arg0: i32) -> (i32, i32, i32) {
    %c0_i32 = arith.constant 0 : i32
    %c0_i32_0 = arith.constant 0 : i32
    %c0_i32_1 = arith.constant 0 : i32
    return %arg0, %c0_i32, %c0_i32_0 : i32, i32, i32
  }
  func.func @transform_2(%arg0: i32) -> (i32, i32) {
    %c0_i32 = arith.constant 0 : i32
    %c0_i32_0 = arith.constant 0 : i32
    %c0_i32_1 = arith.constant 0 : i32
    return %c0_i32, %c0_i32_0 : i32, i32
  }
  func.func @transform_3(%arg0: i32) -> (i32, i32, i32) {
    %c0_i32 = arith.constant 0 : i32
    %c0_i32_0 = arith.constant 0 : i32
    %c0_i32_1 = arith.constant 0 : i32
    %c0_i32_2 = arith.constant 0 : i32
    return %c0_i32, %c0_i32_0, %c0_i32_1 : i32, i32, i32
  }
  func.func @transform_4(%arg0: i32) -> (i32, i32) {
    %c0_i32 = arith.constant 0 : i32
    %c0_i32_0 = arith.constant 0 : i32
    %c0_i32_1 = arith.constant 0 : i32
    return %c0_i32, %c0_i32_0 : i32, i32
  }
  func.func @transform_5(%arg0: i32) -> (i32, i32) {
    %c0_i32 = arith.constant 0 : i32
    %c0_i32_0 = arith.constant 0 : i32
    %c0_i32_1 = arith.constant 0 : i32
    return %c0_i32, %c0_i32_0 : i32, i32
  }
  func.func @transform_6(%arg0: i32) -> (i32, i32) {
    %c0_i32 = arith.constant 0 : i32
    %c0_i32_0 = arith.constant 0 : i32
    %c0_i32_1 = arith.constant 0 : i32
    return %c0_i32, %c0_i32_0 : i32, i32
  }
  func.func @transform_7(%arg0: i32) -> (i32, i32, i32) {
    %c0_i32 = arith.constant 0 : i32
    %c0_i32_0 = arith.constant 0 : i32
    %c0_i32_1 = arith.constant 0 : i32
    return %arg0, %c0_i32, %c0_i32_0 : i32, i32, i32
  }
}

</mosaic_0001>

<bundles_post_ra>
// kernel: tpu_custom_call.1
= control target key start
LH: loop header
LB: loop body
LE: loop exit
PB: predicated region body
PF: predicated region fallthrough
CT: control target
= control target key end

     0   :  { %12 = vsyncpa [#allocation3], 0  ;;  %s2373_s24 = smov [#allocation2]   ;;  %s3121_s0 = inlined_call_operand.vmem [shape: f32[1,64,8], index: 0, kind: input, shape index: {}]   ;;  %s3122_s1 = inlined_call_operand.vmem [shape: bf16[1,64,64], index: 1, kind: input, shape index: {}]   ;;  %s3123_s2 = inlined_call_operand.hbm [shape: bf16[8,32], index: 2, kind: input, shape index: {}]   ;;  %s3124_s3 = inlined_call_operand.vmem [shape: bf16[3,32,128], index: 3, kind: input, shape index: {}]   ;;  %s3125_s4 = inlined_call_operand.vmem [shape: bf16[32,128], index: 4, kind: input, shape index: {}]   ;;  %s3126_s5 = inlined_call_operand.vmem [shape: bf16[32,8], index: 5, kind: input, shape index: {}]   ;;  %s3127_s6 = inlined_call_operand.vmem [shape: f32[2,128], index: 6, kind: input, shape index: {}]   ;;  %s3128_s7 = inlined_call_operand.vmem [shape: f32[1,64,8], index: 7, kind: output, shape index: {}]  }
   0x1   :  { %s23_s25 = sshll.u32 %s2373_s24, 4  ;;  %s24_s25 = int_to_ptr.vmem [resolvable:$true] %s23_s25 }
   0x2   :  { %s2359_s26 = scalar_lea.vmem %s24_s25, 64  ;;  %p2364_p1 = scmp.lt.s32.totalorder %s24_s25, %s24_s25 }
   0x3   :  { %p2360_p0 = scmp.ne.s32.totalorder %s24_s25, %s2359_s26  ;;  %p2365_p2 = scmp.lt.s32.totalorder %s2359_s26, %s2359_s26 }
   0x5   :  { %p2366_p3 = por %p2365_p2, %p2364_p1 }
   0x7   :  { %p2367_p4 = pnand %p2366_p3, %p2360_p0 }
   0x9   :  { %2370 = shalt.err (!%p2367_p4)
}
   0xa   :  { %26 = dma.hbm_to_vmem [thread:$0]  %s3123_s2, 64, %s24_s25, [#allocation3]  }
   0xb   :  { %2371 = dma.done.wait [#allocation3], 64  }
   0xc   :  { %2372 = vsyncadd [#allocation3], 4294967232  ;;  %v56_v0 = vlaneseq  ;;  %vm82_vm0 = vcmask 1043456   ;;  %v64_v2 = vld [vmem:[#allocation2] sm:$0xf]  ;;  %v40_v4 = vld [vmem:[%s3121_s0 + $0x8] sm:$0xff] }
   0xd   :  { %v39_v3 = vld [vmem:[%s3121_s0] sm:$0xff]  ;;  %vm69_vm1 = vcmask 64512   ;;  %2153 = vmatprep.subr.msk.bf16.mxu0 %vm82_vm0, %v64_v2  ;;  %v84_v6 = vsel %vm82_vm0, %v64_v2, 0  ;;  %v41_v8 = vld [vmem:[%s3121_s0 + $0x10] sm:$0xff]  ;;  %v42_v9 = vld [vmem:[%s3121_s0 + $0x18] sm:$0xff]  ;;  %vm179_vm2 = vcmask 523264  }
   0xe   :  { %v57_v1 = vshrl.u32 %v56_v0, 7  ;;  %v60_v7 = vpack.c.bf16 %v40_v4, %v39_v3  ;;  %v43_v10 = vld [vmem:[%s3121_s0 + $0x20] sm:$0xff]  ;;  %2012 = vmatpush3.bf16.msra.mxu0 %v84_v6  ;;  %v61_v11 = vpack.c.bf16 %v42_v9, %v41_v8  ;;  %v44_v12 = vld [vmem:[%s3121_s0 + $0x28] sm:$0xff]  ;;  %v45_v15 = vld [vmem:[%s3121_s0 + $0x30] sm:$0xff]  ;;  %vm277_vm3 = vcmask 261120   ;;  %s2374_s12 = smov 32  }
   0xf   :  { %v62_v13 = vpack.c.bf16 %v44_v12, %v43_v10  ;;  %v55_v14 = vld [vmem:[%s3127_s6] sm:$0x3]  ;;  %v46_v16 = vld [vmem:[%s3121_s0 + $0x38] sm:$0xff]  ;;  %v2456_v19 = vld [vmem:[%s3125_s4 + $0x8] sm:$0xff]   ;;  %s2375_s13 = smov 64   ;;  %s2376_s14 = smov 96  }
  0x10   :  { %v58_v5 = vsub.s32 0, %v57_v1  ;;  %2013 = vmatprep.mubr.msk.bf16.mxu0 %vm69_vm1, %v60_v7  ;;  %v63_v18 = vpack.c.bf16 %v46_v16, %v45_v15  ;;  %2037 = vmatprep.subr.bf16.mxu0 %v2456_v19  ;;  %v2463_v20 = vld [vmem:[%s3125_s4] sm:$0xff]   ;;  %v67_v22 = vsub.s32 1, %v57_v1  ;;  %v2517_v44 = vld [vmem:[%s3122_s1 + $0x8] sm:$0xff]   ;;  %v2522_v45 = vld [vmem:[%s3122_s1 + $0x10] sm:$0xff]  }
  0x11   :  { %2014 = vmatmul.mubr.msk.bf16.vlgmr.msra.gmra.mxu0 %vm69_vm1, %v61_v11  ;;  %v2470_v21 = vld [vmem:[%s3122_s1] sm:$0xff]   ;;  %v2531_v46 = vld [vmem:[%s3122_s1 + $0x18] sm:$0xff]   ;;  %v2164_v47 = vld [vmem:[%s3124_s3 + $0x8] sm:$0xff]  }
  0x12   :  { %v2448_v17 = vrot.slane %v55_v14, %v58_v5  ;;  %2017 = vmatprep.mubr.msk.bf16.mxu0 %vm69_vm1, %v62_v13  ;;  %2038 = vmatpush3.bf16.msra.mxu0 %v2456_v19  ;;  %v2474_v25 = vrot.slane %v55_v14, %v67_v22  ;;  %v2165_v48 = vld [vmem:[%s3124_s3] sm:$0xff]  }
  0x13   :  { %2039 = vmatprep.subr.bf16.mxu0 %v2463_v20  ;;  %2029 = vmatprep.mubr.msk.bf16.mxu1 %vm179_vm2, %v2470_v21 }
  0x16   :  { %2040 = vmatpush3.bf16.msra.mxu0 %v2463_v20 }
  0x19   :  { %2018 = vmatmul.mubr.msk.bf16.gmra.mxu0 %vm69_vm1, %v63_v18 }
  0xd1   :  { %v2015_v23 = vpop.f32.mrf.mxu0 }
  0xd2   :  { %v2486_v31 = vadd.f32 %v2015_v23, %v2474_v25 }
  0xd3   :  { %v120_v24 = vpop.f32.mrf.mxu0 }
  0xd4   :  { %v2480_v29 = vadd.f32 %v120_v24, %v2474_v25 }
  0xd5   :  { %v2016_v26 = vpop.f32.mrf.mxu0 }
  0xd6   :  { %v2477_v27 = vadd.f32 %v2016_v26, %v2474_v25 }
  0xd7   :  { %v123_v28 = vpop.f32.mrf.mxu0 }
  0xd8   :  { %v2483_v30 = vadd.f32 %v123_v28, %v2474_v25  ;;  %v156_v34 = vpack.c.bf16 %v2477_v27, %v2486_v31 }
  0xd9   :  { %v2019_v32 = vpop.f32.mrf.mxu0 }
  0xda   :  { %v155_v33 = vpack.c.bf16 %v2483_v30, %v2480_v29  ;;  %v2495_v37 = vadd.f32 %v2019_v32, %v2474_v25 }
  0xdb   :  { %v136_v35 = vpop.f32.mrf.mxu0 }
  0xdc   :  { %2041 = vmatprep.mubr.msk.bf16.mxu0 %vm277_vm3, %v155_v33  ;;  %v2501_v40 = vadd.f32 %v136_v35, %v2474_v25 }
  0xdd   :  { %v2020_v36 = vpop.f32.mrf.mxu0  ;;  %2042 = vmatmul.mubr.msk.bf16.vlgmr.msra.gmra.mxu0 %vm277_vm3, %v156_v34 }
  0xde   :  { %v2498_v38 = vadd.f32 %v2020_v36, %v2474_v25 }
  0xdf   :  { %v139_v39 = vpop.f32.mrf.mxu0 }
  0xe0   :  { %v158_v41 = vpack.c.bf16 %v2498_v38, %v2495_v37  ;;  %v2506_v42 = vadd.f32 %v139_v39, %v2474_v25 }
  0xe2   :  { %v157_v43 = vpack.c.bf16 %v2506_v42, %v2501_v40  ;;  %2021 = vmatprep.subr.bf16.mxu1 %v158_v41 }
  0xe3   :  { %2022 = vmatpush3.bf16.msra.mxu1 %v158_v41 }
  0xe4   :  { %2023 = vmatprep.subr.bf16.mxu1 %v157_v43  ;;  %2045 = vmatprep.mubr.msk.bf16.mxu0 %vm277_vm3, %v157_v43 }
  0xe5   :  { %2046 = vmatmul.mubr.msk.bf16.gmra.mxu0 %vm277_vm3, %v158_v41 }
  0xe6   :  { %2069 = vmatprep.mubr.msk.bf16.mxu0 %vm179_vm2, %v2470_v21 }
  0xe7   :  { %2024 = vmatpush3.bf16.msra.mxu1 %v157_v43 }
  0xe8   :  { %2025 = vmatprep.subr.bf16.mxu1 %v156_v34 }
  0xeb   :  { %2026 = vmatpush3.bf16.msra.mxu1 %v156_v34 }
  0xec   :  { %2027 = vmatprep.subr.bf16.mxu1 %v155_v33 }
  0xef   :  { %2028 = vmatpush3.bf16.msra.mxu1 %v155_v33 }
  0xf0   :  { %2049 = vmatprep.subr.bf16.mxu1 %v2164_v47 }
  0xf2   :  { %2030 = vmatmul.mubr.msk.bf16.vlgmr.msra.gmra.mxu1 %vm179_vm2, %v2517_v44 }
  0xf3   :  { %2033 = vmatprep.mubr.msk.bf16.mxu1 %vm179_vm2, %v2522_v45  ;;  %2050 = vmatpush3.bf16.msra.mxu1 %v2164_v47 }
  0xf4   :  { %2051 = vmatprep.subr.bf16.mxu1 %v2165_v48 }
  0xf7   :  { %2052 = vmatpush3.bf16.msra.mxu1 %v2165_v48 }
  0xf8   :  { %2077 = vmatprep.subr.bf16.mxu1 %v2456_v19 }
  0xfa   :  { %2034 = vmatmul.mubr.msk.bf16.gmra.mxu1 %vm179_vm2, %v2531_v46 }
 0x19d   :  { %v2043_v61 = vpop.f32.mrf.mxu0 }
 0x19f   :  { %v324_v62 = vpop.f32.mrf.mxu0 }
 0x1a1   :  { %v2044_v63 = vpop.f32.mrf.mxu0 }
 0x1a3   :  { %v327_v0 = vpop.f32.mrf.mxu0 }
 0x1a5   :  { %v2047_v2 = vpop.f32.mrf.mxu0 }
 0x1a7   :  { %v340_v5 = vpop.f32.mrf.mxu0 }
 0x1a9   :  { %v2048_v9 = vpop.f32.mrf.mxu0 }
 0x1ab   :  { %v343_v16 = vpop.f32.mrf.mxu0 }
 0x1b2   :  { %v2031_v49 = vpop.f32.mrf.mxu1 }
 0x1b4   :  { %v226_v50 = vpop.f32.mrf.mxu1 }
 0x1b6   :  { %v2032_v51 = vpop.f32.mrf.mxu1 }
 0x1b7   :  { %v258_v54 = vpack.c.bf16 %v2032_v51, %v2031_v49 }
 0x1b8   :  { %v229_v52 = vpop.f32.mrf.mxu1 }
 0x1b9   :  { %v257_v53 = vpack.c.bf16 %v229_v52, %v226_v50 }
 0x1ba   :  { %v2035_v55 = vpop.f32.mrf.mxu1 }
 0x1bb   :  { %2053 = vmatprep.mubr.msk.bf16.mxu1 %vm277_vm3, %v257_v53 }
 0x1bc   :  { %v242_v56 = vpop.f32.mrf.mxu1  ;;  %2054 = vmatmul.mubr.msk.bf16.vlgmr.msra.gmra.mxu1 %vm277_vm3, %v258_v54 }
 0x1bd   :  { %2078 = vmatpush3.bf16.msra.mxu1 %v2456_v19 }
 0x1be   :  { %v2036_v57 = vpop.f32.mrf.mxu1  ;;  %2079 = vmatprep.subr.bf16.mxu1 %v2463_v20 }
 0x1bf   :  { %v260_v60 = vpack.c.bf16 %v2036_v57, %v2035_v55 }
 0x1c0   :  { %v245_v58 = vpop.f32.mrf.mxu1 }
 0x1c1   :  { %v259_v59 = vpack.c.bf16 %v245_v58, %v242_v56  ;;  %2080 = vmatpush3.bf16.msra.mxu1 %v2463_v20 }
 0x1c3   :  { %2057 = vmatprep.mubr.msk.bf16.mxu1 %vm277_vm3, %v259_v59 }
 0x1c4   :  { %2058 = vmatmul.mubr.msk.bf16.gmra.mxu1 %vm277_vm3, %v260_v60 }
 0x27c   :  { %v2055_v1 = vpop.f32.mrf.mxu1 }
 0x27d   :  { %v422_v22 = vadd.f32 %v2055_v1, %v2043_v61 }
 0x27e   :  { %v413_v3 = vpop.f32.mrf.mxu1 }
 0x27f   :  { %v2568_v32 = vadd.f32 %v422_v22, %v2448_v17  ;;  %v414_v33 = vadd.f32 %v413_v3, %v324_v62 }
 0x280   :  { %v2056_v4 = vpop.f32.mrf.mxu1 }
 0x281   :  { %v425_v26 = vadd.f32 %v2056_v4, %v2044_v63  ;;  %v2578_v36 = vadd.f32 %v414_v33, %v2448_v17  ;;  %v1876_v48 = vmul.f32 -1.442695, %v2568_v32 }
 0x282   :  { %v416_v6 = vpop.f32.mrf.mxu1 }
 0x283   :  { %v2573_v34 = vadd.f32 %v425_v26, %v2448_v17  ;;  %v417_v35 = vadd.f32 %v416_v6, %v327_v0  ;;  %v1874_v50 = vmul.f32 -1.442695, %v2578_v36 }
 0x284   :  { %v2059_v7 = vpop.f32.mrf.mxu1 }
 0x285   :  { %v438_v8 = vadd.f32 %v2059_v7, %v2047_v2  ;;  %v2583_v39 = vadd.f32 %v417_v35, %v2448_v17  ;;  %v1877_v51 = vmul.f32 -1.442695, %v2573_v34 }
 0x286   :  { %v429_v10 = vpop.f32.mrf.mxu1 }
 0x287   :  { %v2550_v11 = vadd.f32 %v438_v8, %v2448_v17  ;;  %v430_v12 = vadd.f32 %v429_v10, %v340_v5  ;;  %v1875_v52 = vmul.f32 -1.442695, %v2583_v39 }
 0x288   :  { %v2060_v13 = vpop.f32.mrf.mxu1 }
 0x289   :  { %v2553_v14 = vadd.f32 %v430_v12, %v2448_v17  ;;  %v441_v15 = vadd.f32 %v2060_v13, %v2048_v9  ;;  %520 = vrot.lane.b32.xlu0 %v2550_v11, %s2374_s12  ;;  %v1880_v41 = vmul.f32 -1.442695, %v2550_v11 }
 0x28a   :  { %v432_v18 = vpop.f32.mrf.mxu1 }
 0x28b   :  { %v2558_v23 = vadd.f32 %v441_v15, %v2448_v17  ;;  %v433_v24 = vadd.f32 %v432_v18, %v343_v16  ;;  %516 = vrot.lane.b32.xlu1 %v2553_v14, %s2374_s12  ;;  %v1878_v43 = vmul.f32 -1.442695, %v2553_v14  ;;  %2172 = vpow2.f32 %v1880_v41 }
 0x28d   :  { %v2563_v28 = vadd.f32 %v433_v24, %v2448_v17  ;;  %522 = vrot.lane.b32.xlu0 %v2558_v23, %s2374_s12  ;;  %v1881_v47 = vmul.f32 -1.442695, %v2558_v23  ;;  %2174 = vpow2.f32 %v1878_v43 }
 0x28f   :  { %518 = vrot.lane.b32.xlu1 %v2563_v28, %s2374_s12  ;;  %2176 = vpow2.f32 %v1881_v47  ;;  %v1879_v49 = vmul.f32 -1.442695, %v2563_v28 }
 0x290   :  { %2178 = vpow2.f32 %v1876_v48 }
 0x291   :  { %512 = vrot.lane.b32.xlu0 %v2568_v32, %s2374_s12  ;;  %2180 = vpow2.f32 %v1879_v49 }
 0x292   :  { %2182 = vpow2.f32 %v1874_v50 }
 0x293   :  { %514 = vrot.lane.b32.xlu1 %v2573_v34, %s2374_s12  ;;  %2184 = vpow2.f32 %v1877_v51 }
 0x294   :  { %2186 = vpow2.f32 %v1875_v52 }
 0x295   :  { %508 = vrot.lane.b32.xlu0 %v2578_v36, %s2374_s12 }
 0x297   :  { %510 = vrot.lane.b32.xlu1 %v2583_v39, %s2374_s12 }
 0x298   :  { %v2173_v53 = vpop.eup %2172 }
 0x299   :  { %v482_v55 = vadd.f32 1.0, %v2173_v53 }
 0x29a   :  { %v2175_v54 = vpop.eup %2174 }
 0x29b   :  { %v480_v57 = vadd.f32 1.0, %v2175_v54  ;;  %2188 = vrcp.f32 %v482_v55 }
 0x29c   :  { %v2177_v56 = vpop.eup %2176 }
 0x29d   :  { %v2179_v58 = vpop.eup %2178  ;;  %v483_v59 = vadd.f32 1.0, %v2177_v56  ;;  %2190 = vrcp.f32 %v480_v57 }
 0x29e   :  { %v2181_v60 = vpop.eup %2180  ;;  %v478_v61 = vadd.f32 1.0, %v2179_v58 }
 0x29f   :  { %v2183_v62 = vpop.eup %2182  ;;  %2192 = vrcp.f32 %v483_v59  ;;  %v481_v63 = vadd.f32 1.0, %v2181_v60 }
 0x2a0   :  { %v2185_v0 = vpop.eup %2184  ;;  %2194 = vrcp.f32 %v478_v61  ;;  %v476_v1 = vadd.f32 1.0, %v2183_v62 }
 0x2a1   :  { %v479_v2 = vadd.f32 1.0, %v2185_v0  ;;  %2196 = vrcp.f32 %v481_v63  ;;  %v2187_v3 = vpop.eup %2186 }
 0x2a2   :  { %2198 = vrcp.f32 %v476_v1  ;;  %v477_v4 = vadd.f32 1.0, %v2187_v3 }
 0x2a3   :  { %2200 = vrcp.f32 %v479_v2 }
 0x2a4   :  { %2202 = vrcp.f32 %v477_v4 }
 0x2a8   :  { %v2597_v5 = vpop.eup %2188 }
 0x2aa   :  { %v2600_v9 = vpop.eup %2190 }
 0x2ac   :  { %v2603_v10 = vpop.eup %2192 }
 0x2ad   :  { %v2607_v18 = vpop.eup %2194 }
 0x2ae   :  { %v2611_v22 = vpop.eup %2196 }
 0x2af   :  { %v2615_v41 = vpop.eup %2198 }
 0x2b0   :  { %v2619_v43 = vpop.eup %2200 }
 0x2b1   :  { %v2625_v51 = vpop.eup %2202 }
 0x2fb   :  { %v521_v6 = vpop.permute.xlu0 %520 }
 0x2fc   :  { %v538_v7 = vmul.f32 %v2597_v5, %v521_v6 }
 0x2fd   :  { %v517_v8 = vpop.permute.xlu1 %516 }
 0x2fe   :  { %560 = vrot.lane.b32.xlu0 %v538_v7, %s2375_s13  ;;  %v536_v13 = vmul.f32 %v2600_v9, %v517_v8  ;;  %v594_v8 = vsub.f32 1.0, %v2597_v5 }
 0x2ff   :  { %v523_v12 = vpop.permute.xlu0 %522 }
 0x300   :  { %v539_v15 = vmul.f32 %v2603_v10, %v523_v12 }
 0x301   :  { %v519_v16 = vpop.permute.xlu1 %518 }
 0x302   :  { %562 = vrot.lane.b32.xlu1 %v539_v15, %s2375_s13  ;;  %556 = vrot.lane.b32.xlu0 %v536_v13, %s2375_s13  ;;  %v537_v26 = vmul.f32 %v2611_v22, %v519_v16  ;;  %v591_v13 = vsub.f32 1.0, %v2619_v43  ;;  %v595_v16 = vsub.f32 1.0, %v2603_v10 }
 0x303   :  { %v513_v24 = vpop.permute.xlu0 %512 }
 0x304   :  { %v534_v33 = vmul.f32 %v2607_v18, %v513_v24 }
 0x305   :  { %v515_v35 = vpop.permute.xlu1 %514 }
 0x306   :  { %558 = vrot.lane.b32.xlu1 %v537_v26, %s2375_s13  ;;  %552 = vrot.lane.b32.xlu0 %v534_v33, %s2375_s13  ;;  %v535_v48 = vmul.f32 %v2619_v43, %v515_v35 }
 0x307   :  { %v509_v47 = vpop.permute.xlu0 %508 }
 0x308   :  { %v532_v49 = vmul.f32 %v2615_v41, %v509_v47 }
 0x309   :  { %v511_v50 = vpop.permute.xlu1 %510 }
 0x30a   :  { %554 = vrot.lane.b32.xlu1 %v535_v48, %s2375_s13  ;;  %548 = vrot.lane.b32.xlu0 %v532_v49, %s2375_s13  ;;  %v533_v52 = vmul.f32 %v2625_v51, %v511_v50  ;;  %v593_v50 = vsub.f32 1.0, %v2611_v22 }
 0x30e   :  { %550 = vrot.lane.b32.xlu1 %v533_v52, %s2375_s13  ;;  %656 = vrot.lane.b32.xlu0 %v2495_v37, %s2374_s12 }
 0x312   :  { %658 = vrot.lane.b32.xlu1 %v2498_v38, %s2374_s12  ;;  %652 = vrot.lane.b32.xlu0 %v2501_v40, %s2374_s12 }
 0x316   :  { %654 = vrot.lane.b32.xlu1 %v2506_v42, %s2374_s12  ;;  %648 = vrot.lane.b32.xlu0 %v2486_v31, %s2374_s12 }
 0x31a   :  { %650 = vrot.lane.b32.xlu1 %v2477_v27, %s2374_s12 }
 0x370   :  { %v561_v53 = vpop.permute.xlu0 %560 }
 0x371   :  { %v578_v38 = vadd.f32 %v561_v53, %v2550_v11 }
 0x374   :  { %v563_v54 = vpop.permute.xlu1 %562  ;;  %v557_v55 = vpop.permute.xlu0 %556 }
 0x375   :  { %v579_v42 = vadd.f32 %v563_v54, %v2558_v23  ;;  %v576_v31 = vadd.f32 %v557_v55, %v2553_v14 }
 0x378   :  { %v559_v56 = vpop.permute.xlu1 %558  ;;  %v553_v37 = vpop.permute.xlu0 %552 }
 0x379   :  { %v574_v57 = vadd.f32 %v553_v37, %v2568_v32  ;;  %v577_v59 = vadd.f32 %v559_v56, %v2563_v28 }
 0x37b   :  { %2204 = vtanh.f32 %v574_v57 }
 0x37c   :  { %v555_v40 = vpop.permute.xlu1 %554  ;;  %v549_v27 = vpop.permute.xlu0 %548 }
 0x37d   :  { %v575_v58 = vadd.f32 %v555_v40, %v2573_v34  ;;  %v572_v60 = vadd.f32 %v549_v27, %v2578_v36 }
 0x37f   :  { %2206 = vtanh.f32 %v575_v58 }
 0x380   :  { %2208 = vtanh.f32 %v578_v38  ;;  %v551_v32 = vpop.permute.xlu1 %550  ;;  %v657_v63 = vpop.permute.xlu0 %656 }
 0x381   :  { %2210 = vtanh.f32 %v579_v42  ;;  %v573_v11 = vadd.f32 %v551_v32, %v2583_v39  ;;  %v674_v26 = vmul.f32 %v2597_v5, %v657_v63 }
 0x382   :  { %2212 = vtanh.f32 %v576_v31 }
 0x383   :  { %2214 = vtanh.f32 %v577_v59  ;;  %v588_v59 = vsub.f32 1.0, %v2615_v41 }
 0x384   :  { %2216 = vtanh.f32 %v572_v60  ;;  %v659_v0 = vpop.permute.xlu1 %658  ;;  %v653_v1 = vpop.permute.xlu0 %652  ;;  %v589_v60 = vsub.f32 1.0, %v2625_v51 }
 0x385   :  { %2218 = vtanh.f32 %v573_v11  ;;  %v675_v33 = vmul.f32 %v2603_v10, %v659_v0  ;;  %v672_v56 = vmul.f32 %v2600_v9, %v653_v1  ;;  %v2167_v0 = vld [vmem:[%s3124_s3 + $0x10] sm:$0xff]  }
 0x388   :  { %v2205_v61 = vpop.eup %2204  ;;  %v655_v2 = vpop.permute.xlu1 %654 }
 0x389   :  { %608 = vrot.lane.b32.xlu0 %v2205_v61, %s2376_s14  ;;  %v649_v3 = vpop.permute.xlu0 %648  ;;  %v673_v37 = vmul.f32 %v2611_v22, %v655_v2 }
 0x38a   :  { %v670_v10 = vmul.f32 %v2607_v18, %v649_v3 }
 0x38c   :  { %v2207_v23 = vpop.eup %2206  ;;  %v651_v4 = vpop.permute.xlu1 %650 }
 0x38d   :  { %v2209_v34 = vpop.eup %2208  ;;  %610 = vrot.lane.b32.xlu1 %v2207_v23, %s2376_s14  ;;  %v671_v49 = vmul.f32 %v2619_v43, %v651_v4 }
 0x38e   :  { %616 = vrot.lane.b32.xlu0 %v2209_v34, %s2376_s14  ;;  %v2211_v14 = vpop.eup %2210 }
 0x38f   :  { %v2213_v28 = vpop.eup %2212 }
 0x390   :  { %v2215_v36 = vpop.eup %2214 }
 0x391   :  { %618 = vrot.lane.b32.xlu1 %v2211_v14, %s2376_s14  ;;  %v2217_v39 = vpop.eup %2216 }
 0x392   :  { %612 = vrot.lane.b32.xlu0 %v2213_v28, %s2376_s14  ;;  %v2219_v62 = vpop.eup %2218 }
 0x395   :  { %614 = vrot.lane.b32.xlu1 %v2215_v36, %s2376_s14 }
 0x396   :  { %604 = vrot.lane.b32.xlu0 %v2217_v39, %s2376_s14 }
 0x399   :  { %606 = vrot.lane.b32.xlu1 %v2219_v62, %s2376_s14 }
 0x39a   :  { %644 = vrot.lane.b32.xlu0 %v2480_v29, %s2374_s12  ;;  %v590_v29 = vsub.f32 1.0, %v2607_v18 }
 0x39d   :  { %646 = vrot.lane.b32.xlu1 %v2483_v30, %s2374_s12  ;;  %v592_v30 = vsub.f32 1.0, %v2600_v9 }
 0x3fb   :  { %v609_v6 = vpop.permute.xlu0 %608 }
 0x3fc   :  { %v630_v52 = vmul.f32 %v609_v6, %v590_v29 }
 0x3fe   :  { %v2681_v58 = vadd.f32 %v670_v10, %v630_v52 }
 0x3ff   :  { %v611_v7 = vpop.permute.xlu1 %610 }
 0x400   :  { %v617_v12 = vpop.permute.xlu0 %616  ;;  %v631_v35 = vmul.f32 %v611_v7, %v591_v13 }
 0x401   :  { %v634_v15 = vmul.f32 %v617_v12, %v594_v8 }
 0x402   :  { %v2677_v57 = vadd.f32 %v671_v49, %v631_v35 }
 0x403   :  { %v619_v24 = vpop.permute.xlu1 %618  ;;  %v2670_v53 = vadd.f32 %v674_v26, %v634_v15 }
 0x404   :  { %v635_v47 = vmul.f32 %v619_v24, %v595_v16  ;;  %v613_v48 = vpop.permute.xlu0 %612  ;;  %v685_v18 = vpack.c.bf16 %v2677_v57, %v2681_v58 }
 0x405   :  { %v632_v55 = vmul.f32 %v613_v48, %v592_v30 }
 0x406   :  { %v2672_v54 = vadd.f32 %v675_v33, %v635_v47 }
 0x407   :  { %v615_v5 = vpop.permute.xlu1 %614  ;;  %v2683_v42 = vadd.f32 %v672_v56, %v632_v55 }
 0x408   :  { %v633_v38 = vmul.f32 %v615_v5, %v593_v50  ;;  %v605_v40 = vpop.permute.xlu0 %604  ;;  %v687_v43 = vpack.c.bf16 %v2672_v54, %v2670_v53 }
 0x409   :  { %v628_v61 = vmul.f32 %v605_v40, %v588_v59 }
 0x40a   :  { %v2685_v31 = vadd.f32 %v673_v37, %v633_v38  ;;  %698 = vrot.lane.b32.xlu0 %v687_v43, %s2376_s14 }
 0x40b   :  { %v607_v9 = vpop.permute.xlu1 %606 }
 0x40c   :  { %v645_v22 = vpop.permute.xlu0 %644  ;;  %v686_v27 = vpack.c.bf16 %v2685_v31, %v2683_v42  ;;  %v629_v23 = vmul.f32 %v607_v9, %v589_v60 }
 0x40d   :  { %v668_v32 = vmul.f32 %v2615_v41, %v645_v22 }
 0x40e   :  { %694 = vrot.lane.b32.xlu0 %v685_v18, %s2376_s14  ;;  %696 = vrot.lane.b32.xlu1 %v686_v27, %s2376_s14 }
 0x40f   :  { %v647_v11 = vpop.permute.xlu1 %646  ;;  %v2698_v14 = vadd.f32 %v668_v32, %v628_v61 }
 0x410   :  { %v669_v34 = vmul.f32 %v2625_v51, %v647_v11  ;;  %v2166_v51 = vld [vmem:[%s3124_s3 + $0x18] sm:$0xff]  }
 0x412   :  { %v2700_v28 = vadd.f32 %v669_v34, %v629_v23 }
 0x414   :  { %v684_v36 = vpack.c.bf16 %v2700_v28, %v2698_v14 }
 0x416   :  { %692 = vrot.lane.b32.xlu1 %v684_v36, %s2376_s14 }
 0x47c   :  { %v699_v39 = vpop.permute.xlu0 %698 }
 0x47d   :  { %2061 = vmatprep.subr.bf16.mxu0 %v699_v39 }
 0x47e   :  { %2062 = vmatpush3.bf16.msra.mxu0 %v699_v39 }
 0x480   :  { %v697_v41 = vpop.permute.xlu1 %696  ;;  %v695_v62 = vpop.permute.xlu0 %694 }
 0x481   :  { %2063 = vmatprep.subr.bf16.mxu0 %v697_v41 }
 0x482   :  { %2064 = vmatpush3.bf16.msra.mxu0 %v697_v41 }
 0x483   :  { %2065 = vmatprep.subr.bf16.mxu0 %v695_v62 }
 0x486   :  { %2066 = vmatpush3.bf16.msra.mxu0 %v695_v62 }
 0x488   :  { %v693_v63 = vpop.permute.xlu1 %692 }
 0x489   :  { %2067 = vmatprep.subr.bf16.mxu0 %v693_v63  ;;  %2081 = vmatprep.mubr.msk.bf16.mxu1 %vm277_vm3, %v693_v63 }
 0x48a   :  { %2068 = vmatpush3.bf16.msra.mxu0 %v693_v63  ;;  %2082 = vmatmul.mubr.msk.bf16.vlgmr.msra.gmra.mxu1 %vm277_vm3, %v695_v62 }
 0x48b   :  { %2085 = vmatprep.mubr.msk.bf16.mxu1 %vm277_vm3, %v697_v41  ;;  %2089 = vmatprep.subr.bf16.mxu0 %v2166_v51 }
 0x48d   :  { %2070 = vmatmul.mubr.msk.bf16.vlgmr.msra.gmra.mxu0 %vm179_vm2, %v2517_v44 }
 0x48e   :  { %2073 = vmatprep.mubr.msk.bf16.mxu0 %vm179_vm2, %v2522_v45  ;;  %2090 = vmatpush3.bf16.msra.mxu0 %v2166_v51 }
 0x48f   :  { %2091 = vmatprep.subr.bf16.mxu0 %v2167_v0 }
 0x492   :  { %2086 = vmatmul.mubr.msk.bf16.gmra.mxu1 %vm277_vm3, %v699_v39  ;;  %2092 = vmatpush3.bf16.msra.mxu0 %v2167_v0 }
 0x493   :  { %2109 = vmatprep.mubr.msk.bf16.mxu1 %vm179_vm2, %v2470_v21  ;;  %2117 = vmatprep.subr.bf16.mxu0 %v2456_v19 }
 0x495   :  { %2074 = vmatmul.mubr.msk.bf16.gmra.mxu0 %vm179_vm2, %v2531_v46 }
 0x54a   :  { %v2083_v13 = vpop.f32.mrf.mxu1 }
 0x54c   :  { %v824_v15 = vpop.f32.mrf.mxu1 }
 0x54d   :  { %v2071_v44 = vpop.f32.mrf.mxu0 }
 0x54e   :  { %v2084_v16 = vpop.f32.mrf.mxu1 }
 0x54f   :  { %v738_v1 = vpop.f32.mrf.mxu0 }
 0x550   :  { %v827_v29 = vpop.f32.mrf.mxu1 }
 0x551   :  { %v2072_v45 = vpop.f32.mrf.mxu0 }
 0x552   :  { %v770_v4 = vpack.c.bf16 %v2072_v45, %v2071_v44  ;;  %v2087_v30 = vpop.f32.mrf.mxu1 }
 0x553   :  { %v741_v2 = vpop.f32.mrf.mxu0 }
 0x554   :  { %v769_v3 = vpack.c.bf16 %v741_v2, %v738_v1  ;;  %v840_v33 = vpop.f32.mrf.mxu1 }
 0x555   :  { %v2075_v6 = vpop.f32.mrf.mxu0 }
 0x556   :  { %2093 = vmatprep.mubr.msk.bf16.mxu0 %vm277_vm3, %v769_v3  ;;  %v2088_v49 = vpop.f32.mrf.mxu1 }
 0x557   :  { %v754_v21 = vpop.f32.mrf.mxu0  ;;  %2094 = vmatmul.mubr.msk.bf16.vlgmr.msra.gmra.mxu0 %vm277_vm3, %v770_v4 }
 0x558   :  { %2118 = vmatpush3.bf16.msra.mxu0 %v2456_v19  ;;  %v843_v37 = vpop.f32.mrf.mxu1 }
 0x559   :  { %v2076_v46 = vpop.f32.mrf.mxu0  ;;  %2119 = vmatprep.subr.bf16.mxu0 %v2463_v20 }
 0x55a   :  { %v772_v12 = vpack.c.bf16 %v2076_v46, %v2075_v6 }
 0x55b   :  { %v757_v7 = vpop.f32.mrf.mxu0 }
 0x55c   :  { %v771_v8 = vpack.c.bf16 %v757_v7, %v754_v21  ;;  %2120 = vmatpush3.bf16.msra.mxu0 %v2463_v20 }
 0x55e   :  { %2097 = vmatprep.mubr.msk.bf16.mxu0 %vm277_vm3, %v771_v8 }
 0x55f   :  { %2098 = vmatmul.mubr.msk.bf16.gmra.mxu0 %vm277_vm3, %v772_v12 }
 0x617   :  { %v2095_v24 = vpop.f32.mrf.mxu0 }
 0x618   :  { %v922_v10 = vadd.f32 %v2095_v24, %v2083_v13 }
 0x619   :  { %v913_v26 = vpop.f32.mrf.mxu0 }
 0x61a   :  { %v2747_v9 = vadd.f32 %v922_v10, %v2448_v17  ;;  %v914_v22 = vadd.f32 %v913_v26, %v824_v15 }
 0x61b   :  { %v2096_v19 = vpop.f32.mrf.mxu0 }
 0x61c   :  { %v925_v18 = vadd.f32 %v2096_v19, %v2084_v16  ;;  %v2757_v59 = vadd.f32 %v914_v22, %v2448_v17  ;;  %v1902_v36 = vmul.f32 -1.442695, %v2747_v9 }
 0x61d   :  { %v916_v35 = vpop.f32.mrf.mxu0 }
 0x61e   :  { %v2760_v60 = vadd.f32 %v925_v18, %v2448_v17  ;;  %v917_v32 = vadd.f32 %v916_v35, %v827_v29  ;;  %v1900_v41 = vmul.f32 -1.442695, %v2757_v59 }
 0x61f   :  { %v2099_v47 = vpop.f32.mrf.mxu0 }
 0x620   :  { %v938_v48 = vadd.f32 %v2099_v47, %v2087_v30  ;;  %v2767_v11 = vadd.f32 %v917_v32, %v2448_v17  ;;  %v1903_v62 = vmul.f32 -1.442695, %v2760_v60 }
 0x621   :  { %v929_v50 = vpop.f32.mrf.mxu0 }
 0x622   :  { %v2732_v20 = vadd.f32 %v938_v48, %v2448_v17  ;;  %v930_v52 = vadd.f32 %v929_v50, %v840_v33  ;;  %v1901_v51 = vmul.f32 -1.442695, %v2767_v11 }
 0x623   :  { %v2100_v55 = vpop.f32.mrf.mxu0 }
 0x624   :  { %v941_v56 = vadd.f32 %v2100_v55, %v2088_v49  ;;  %1020 = vrot.lane.b32.xlu0 %v2732_v20, %s2374_s12  ;;  %v2737_v38 = vadd.f32 %v930_v52, %v2448_v17  ;;  %v1906_v61 = vmul.f32 -1.442695, %v2732_v20 }
 0x625   :  { %v932_v5 = vpop.f32.mrf.mxu0 }
 0x626   :  { %v2740_v40 = vadd.f32 %v941_v56, %v2448_v17  ;;  %v933_v43 = vadd.f32 %v932_v5, %v843_v37  ;;  %v1904_v23 = vmul.f32 -1.442695, %v2737_v38  ;;  %2220 = vpow2.f32 %v1906_v61 }
 0x628   :  { %1022 = vrot.lane.b32.xlu1 %v2740_v40, %s2374_s12  ;;  %1016 = vrot.lane.b32.xlu0 %v2737_v38, %s2374_s12  ;;  %v2750_v27 = vadd.f32 %v933_v43, %v2448_v17  ;;  %v1907_v34 = vmul.f32 -1.442695, %v2740_v40  ;;  %2222 = vpow2.f32 %v1904_v23 }
 0x62a   :  { %2224 = vpow2.f32 %v1907_v34  ;;  %v1905_v39 = vmul.f32 -1.442695, %v2750_v27 }
 0x62b   :  { %2226 = vpow2.f32 %v1902_v36 }
 0x62c   :  { %1018 = vrot.lane.b32.xlu1 %v2750_v27, %s2374_s12  ;;  %1012 = vrot.lane.b32.xlu0 %v2747_v9, %s2374_s12  ;;  %2228 = vpow2.f32 %v1905_v39 }
 0x62d   :  { %2230 = vpow2.f32 %v1900_v41 }
 0x62e   :  { %2232 = vpow2.f32 %v1903_v62 }
 0x62f   :  { %2234 = vpow2.f32 %v1901_v51 }
 0x630   :  { %1014 = vrot.lane.b32.xlu1 %v2760_v60, %s2374_s12  ;;  %1008 = vrot.lane.b32.xlu0 %v2757_v59, %s2374_s12 }
 0x633   :  { %v2221_v63 = vpop.eup %2220 }
 0x634   :  { %1010 = vrot.lane.b32.xlu1 %v2767_v11, %s2374_s12  ;;  %v982_v44 = vadd.f32 1.0, %v2221_v63 }
 0x635   :  { %v2223_v0 = vpop.eup %2222 }
 0x636   :  { %v980_v45 = vadd.f32 1.0, %v2223_v0  ;;  %2236 = vrcp.f32 %v982_v44 }
 0x637   :  { %v2225_v1 = vpop.eup %2224 }
 0x638   :  { %v2227_v2 = vpop.eup %2226  ;;  %v983_v3 = vadd.f32 1.0, %v2225_v1  ;;  %2238 = vrcp.f32 %v980_v45 }
 0x639   :  { %v2229_v4 = vpop.eup %2228  ;;  %v978_v6 = vadd.f32 1.0, %v2227_v2 }
 0x63a   :  { %v2231_v21 = vpop.eup %2230  ;;  %2240 = vrcp.f32 %v983_v3  ;;  %v981_v46 = vadd.f32 1.0, %v2229_v4 }
 0x63b   :  { %v2233_v7 = vpop.eup %2232  ;;  %2242 = vrcp.f32 %v978_v6  ;;  %v976_v8 = vadd.f32 1.0, %v2231_v21 }
 0x63c   :  { %v979_v12 = vadd.f32 1.0, %v2233_v7  ;;  %2244 = vrcp.f32 %v981_v46  ;;  %v2235_v13 = vpop.eup %2234 }
 0x63d   :  { %2246 = vrcp.f32 %v976_v8  ;;  %v977_v15 = vadd.f32 1.0, %v2235_v13 }
 0x63e   :  { %2248 = vrcp.f32 %v979_v12 }
 0x63f   :  { %2250 = vrcp.f32 %v977_v15 }
 0x643   :  { %v2779_v16 = vpop.eup %2236 }
 0x644   :  { %v1094_v7 = vsub.f32 1.0, %v2779_v16  ;;  %v1142_v15 = vmul.f32 %v2779_v16, %v2670_v53 }
 0x645   :  { %v2782_v30 = vpop.eup %2238 }
 0x646   :  { %v1140_v53 = vmul.f32 %v2782_v30, %v2683_v42 }
 0x647   :  { %v2785_v26 = vpop.eup %2240 }
 0x648   :  { %v2789_v48 = vpop.eup %2242  ;;  %v1095_v12 = vsub.f32 1.0, %v2785_v26 }
 0x649   :  { %v2793_v49 = vpop.eup %2244  ;;  %v1138_v42 = vmul.f32 %v2789_v48, %v2681_v58 }
 0x64a   :  { %v2797_v37 = vpop.eup %2246 }
 0x64b   :  { %v2801_v5 = vpop.eup %2248 }
 0x64c   :  { %v2807_v32 = vpop.eup %2250 }
 0x64d   :  { %v1089_v58 = vsub.f32 1.0, %v2807_v32 }
 0x696   :  { %v1021_v29 = vpop.permute.xlu0 %1020 }
 0x697   :  { %v1038_v24 = vmul.f32 %v2779_v16, %v1021_v29  ;;  %v1143_v29 = vmul.f32 %v2785_v26, %v2672_v54  ;;  %v1141_v54 = vmul.f32 %v2793_v49, %v2685_v31  ;;  %v1139_v31 = vmul.f32 %v2801_v5, %v2677_v57 }
 0x698   :  { %v1136_v57 = vmul.f32 %v2797_v37, %v2698_v14 }
 0x699   :  { %1060 = vrot.lane.b32.xlu0 %v1038_v24, %s2375_s13 }
 0x69a   :  { %v1023_v19 = vpop.permute.xlu1 %1022  ;;  %v1017_v33 = vpop.permute.xlu0 %1016 }
 0x69b   :  { %v1039_v35 = vmul.f32 %v2785_v26, %v1023_v19  ;;  %v1036_v47 = vmul.f32 %v2782_v30, %v1017_v33  ;;  %v1092_v19 = vsub.f32 1.0, %v2782_v30 }
 0x69d   :  { %1062 = vrot.lane.b32.xlu1 %v1039_v35, %s2375_s13  ;;  %1056 = vrot.lane.b32.xlu0 %v1036_v47, %s2375_s13 }
 0x69e   :  { %v1019_v50 = vpop.permute.xlu1 %1018  ;;  %v1013_v52 = vpop.permute.xlu0 %1012 }
 0x69f   :  { %v1037_v55 = vmul.f32 %v2793_v49, %v1019_v50  ;;  %v1034_v56 = vmul.f32 %v2789_v48, %v1013_v52  ;;  %v1093_v52 = vsub.f32 1.0, %v2793_v49 }
 0x6a1   :  { %1058 = vrot.lane.b32.xlu1 %v1037_v55, %s2375_s13  ;;  %1052 = vrot.lane.b32.xlu0 %v1034_v56, %s2375_s13  ;;  %v1090_v56 = vsub.f32 1.0, %v2789_v48 }
 0x6a2   :  { %v1015_v10 = vpop.permute.xlu1 %1014  ;;  %v1009_v43 = vpop.permute.xlu0 %1008 }
 0x6a3   :  { %v1035_v22 = vmul.f32 %v2801_v5, %v1015_v10  ;;  %v1032_v18 = vmul.f32 %v2797_v37, %v1009_v43 }
 0x6a5   :  { %1054 = vrot.lane.b32.xlu1 %v1035_v22, %s2375_s13  ;;  %1048 = vrot.lane.b32.xlu0 %v1032_v18, %s2375_s13 }
 0x6a6   :  { %v1011_v61 = vpop.permute.xlu1 %1010 }
 0x6a7   :  { %v1033_v23 = vmul.f32 %v2807_v32, %v1011_v61  ;;  %v1091_v61 = vsub.f32 1.0, %v2801_v5  ;;  %v1137_v5 = vmul.f32 %v2807_v32, %v2700_v28 }
 0x6a9   :  { %1050 = vrot.lane.b32.xlu1 %v1033_v23, %s2375_s13  ;;  %v1088_v23 = vsub.f32 1.0, %v2797_v37  ;;  %v2168_v37 = vld [vmem:[%s3124_s3 + $0x28] sm:$0xff]  }
 0x70b   :  { %v1061_v34 = vpop.permute.xlu0 %1060 }
 0x70c   :  { %v1078_v36 = vadd.f32 %v1061_v34, %v2732_v20 }
 0x70e   :  { %2252 = vtanh.f32 %v1078_v36 }
 0x70f   :  { %v1063_v39 = vpop.permute.xlu1 %1062  ;;  %v1057_v41 = vpop.permute.xlu0 %1056 }
 0x710   :  { %v1079_v62 = vadd.f32 %v1063_v39, %v2740_v40  ;;  %v1076_v51 = vadd.f32 %v1057_v41, %v2737_v38 }
 0x712   :  { %2254 = vtanh.f32 %v1079_v62 }
 0x713   :  { %2256 = vtanh.f32 %v1076_v51  ;;  %v1059_v63 = vpop.permute.xlu1 %1058  ;;  %v1053_v0 = vpop.permute.xlu0 %1052 }
 0x714   :  { %v1077_v44 = vadd.f32 %v1059_v63, %v2750_v27  ;;  %v1074_v1 = vadd.f32 %v1053_v0, %v2747_v9 }
 0x716   :  { %2258 = vtanh.f32 %v1077_v44 }
 0x717   :  { %2260 = vtanh.f32 %v1074_v1  ;;  %v1055_v45 = vpop.permute.xlu1 %1054  ;;  %v1049_v2 = vpop.permute.xlu0 %1048 }
 0x718   :  { %v1075_v20 = vadd.f32 %v1055_v45, %v2760_v60  ;;  %v1072_v3 = vadd.f32 %v1049_v2, %v2757_v59  ;;  %v2348_v2 = vld [vmem:[%s3122_s1 + $0x8] sm:$0xff]  }
 0x71a   :  { %2262 = vtanh.f32 %v1075_v20  ;;  %v2349_v20 = vld [vmem:[%s3122_s1 + $0x10] sm:$0xff]  }
 0x71b   :  { %v2253_v40 = vpop.eup %2252  ;;  %2264 = vtanh.f32 %v1072_v3  ;;  %v1051_v38 = vpop.permute.xlu1 %1050  ;;  %v2350_v3 = vld [vmem:[%s3122_s1 + $0x18] sm:$0xff]  }
 0x71c   :  { %v1073_v4 = vadd.f32 %v1051_v38, %v2767_v11  ;;  %1116 = vrot.lane.b32.xlu0 %v2253_v40, %s2376_s14  ;;  %v2169_v40 = vld [vmem:[%s3124_s3 + $0x20] sm:$0xff]  }
 0x71e   :  { %2266 = vtanh.f32 %v1073_v4 }
 0x71f   :  { %v2255_v27 = vpop.eup %2254 }
 0x720   :  { %v2257_v6 = vpop.eup %2256  ;;  %1118 = vrot.lane.b32.xlu1 %v2255_v27, %s2376_s14 }
 0x721   :  { %1112 = vrot.lane.b32.xlu0 %v2257_v6, %s2376_s14 }
 0x723   :  { %v2259_v9 = vpop.eup %2258 }
 0x724   :  { %v2261_v21 = vpop.eup %2260  ;;  %1114 = vrot.lane.b32.xlu1 %v2259_v9, %s2376_s14 }
 0x725   :  { %1108 = vrot.lane.b32.xlu0 %v2261_v21, %s2376_s14 }
 0x727   :  { %v2263_v59 = vpop.eup %2262 }
 0x728   :  { %v2265_v60 = vpop.eup %2264  ;;  %1110 = vrot.lane.b32.xlu1 %v2263_v59, %s2376_s14 }
 0x729   :  { %1104 = vrot.lane.b32.xlu0 %v2265_v60, %s2376_s14 }
 0x72b   :  { %v2267_v11 = vpop.eup %2266 }
 0x72c   :  { %1106 = vrot.lane.b32.xlu1 %v2267_v11, %s2376_s14 }
 0x78e   :  { %v1117_v46 = vpop.permute.xlu0 %1116 }
 0x78f   :  { %v1134_v8 = vmul.f32 %v1117_v46, %v1094_v7 }
 0x791   :  { %v2834_v35 = vadd.f32 %v1142_v15, %v1134_v8 }
 0x792   :  { %v1119_v13 = vpop.permute.xlu1 %1118 }
 0x793   :  { %v1135_v24 = vmul.f32 %v1119_v13, %v1095_v12  ;;  %v1113_v33 = vpop.permute.xlu0 %1112 }
 0x794   :  { %v1132_v50 = vmul.f32 %v1113_v33, %v1092_v19 }
 0x795   :  { %v2836_v47 = vadd.f32 %v1143_v29, %v1135_v24 }
 0x796   :  { %v1115_v55 = vpop.permute.xlu1 %1114  ;;  %v2846_v43 = vadd.f32 %v1140_v53, %v1132_v50 }
 0x797   :  { %v1133_v16 = vmul.f32 %v1115_v55, %v1093_v52  ;;  %v1109_v26 = vpop.permute.xlu0 %1108  ;;  %v1155_v10 = vpack.c.bf16 %v2836_v47, %v2834_v35 }
 0x798   :  { %v1130_v18 = vmul.f32 %v1109_v26, %v1090_v56 }
 0x799   :  { %v2848_v22 = vadd.f32 %v1141_v54, %v1133_v16  ;;  %1166 = vrot.lane.b32.xlu0 %v1155_v10, %s2376_s14 }
 0x79a   :  { %v1111_v30 = vpop.permute.xlu1 %1110  ;;  %v2859_v39 = vadd.f32 %v1138_v42, %v1130_v18 }
 0x79b   :  { %v1131_v49 = vmul.f32 %v1111_v30, %v1091_v61  ;;  %v1105_v34 = vpop.permute.xlu0 %1104  ;;  %v1154_v36 = vpack.c.bf16 %v2848_v22, %v2846_v43 }
 0x79c   :  { %v1128_v62 = vmul.f32 %v1105_v34, %v1088_v23 }
 0x79d   :  { %v2861_v41 = vadd.f32 %v1139_v31, %v1131_v49  ;;  %1164 = vrot.lane.b32.xlu1 %v1154_v36, %s2376_s14 }
 0x79e   :  { %v1107_v48 = vpop.permute.xlu1 %1106  ;;  %v2871_v0 = vadd.f32 %v1136_v57, %v1128_v62 }
 0x79f   :  { %v1129_v51 = vmul.f32 %v1107_v48, %v1089_v58  ;;  %v1153_v63 = vpack.c.bf16 %v2861_v41, %v2859_v39 }
 0x7a1   :  { %v2873_v44 = vadd.f32 %v1137_v5, %v1129_v51  ;;  %1162 = vrot.lane.b32.xlu0 %v1153_v63, %s2376_s14 }
 0x7a3   :  { %v1152_v1 = vpack.c.bf16 %v2873_v44, %v2871_v0 }
 0x7a5   :  { %1160 = vrot.lane.b32.xlu1 %v1152_v1, %s2376_s14 }
 0x80b   :  { %v1167_v45 = vpop.permute.xlu0 %1166 }
 0x80c   :  { %2101 = vmatprep.subr.bf16.mxu1 %v1167_v45 }
 0x80d   :  { %2102 = vmatpush3.bf16.msra.mxu1 %v1167_v45 }
 0x80f   :  { %v1165_v14 = vpop.permute.xlu1 %1164 }
 0x810   :  { %2103 = vmatprep.subr.bf16.mxu1 %v1165_v14 }
 0x811   :  { %2104 = vmatpush3.bf16.msra.mxu1 %v1165_v14 }
 0x813   :  { %v1163_v28 = vpop.permute.xlu0 %1162 }
 0x814   :  { %2105 = vmatprep.subr.bf16.mxu1 %v1163_v28 }
 0x815   :  { %2106 = vmatpush3.bf16.msra.mxu1 %v1163_v28 }
 0x817   :  { %v1161_v32 = vpop.permute.xlu1 %1160 }
 0x818   :  { %2107 = vmatprep.subr.bf16.mxu1 %v1161_v32  ;;  %2121 = vmatprep.mubr.msk.bf16.mxu0 %vm277_vm3, %v1161_v32 }
 0x819   :  { %2108 = vmatpush3.bf16.msra.mxu1 %v1161_v32  ;;  %2122 = vmatmul.mubr.msk.bf16.vlgmr.msra.gmra.mxu0 %vm277_vm3, %v1163_v28 }
 0x81a   :  { %2125 = vmatprep.mubr.msk.bf16.mxu0 %vm277_vm3, %v1165_v14  ;;  %2129 = vmatprep.subr.bf16.mxu1 %v2168_v37 }
 0x81c   :  { %2110 = vmatmul.mubr.msk.bf16.vlgmr.msra.gmra.mxu1 %vm179_vm2, %v2348_v2 }
 0x81d   :  { %2113 = vmatprep.mubr.msk.bf16.mxu1 %vm179_vm2, %v2349_v20  ;;  %2130 = vmatpush3.bf16.msra.mxu1 %v2168_v37 }
 0x81e   :  { %2131 = vmatprep.subr.bf16.mxu1 %v2169_v40 }
 0x821   :  { %2126 = vmatmul.mubr.msk.bf16.gmra.mxu0 %vm277_vm3, %v1167_v45  ;;  %2132 = vmatpush3.bf16.msra.mxu1 %v2169_v40 }
 0x824   :  { %2114 = vmatmul.mubr.msk.bf16.gmra.mxu1 %vm179_vm2, %v2350_v3 }
 0x8d9   :  { %v2123_v12 = vpop.f32.mrf.mxu0 }
 0x8db   :  { %v1292_v13 = vpop.f32.mrf.mxu0 }
 0x8dc   :  { %v2111_v38 = vpop.f32.mrf.mxu1 }
 0x8dd   :  { %v2124_v15 = vpop.f32.mrf.mxu0 }
 0x8de   :  { %v1206_v4 = vpop.f32.mrf.mxu1 }
 0x8df   :  { %v1295_v29 = vpop.f32.mrf.mxu0 }
 0x8e0   :  { %v2112_v27 = vpop.f32.mrf.mxu1 }
 0x8e1   :  { %v1238_v21 = vpack.c.bf16 %v2112_v27, %v2111_v38  ;;  %v2127_v19 = vpop.f32.mrf.mxu0 }
 0x8e2   :  { %v1209_v6 = vpop.f32.mrf.mxu1 }
 0x8e3   :  { %v1237_v9 = vpack.c.bf16 %v1209_v6, %v1206_v4  ;;  %v1308_v53 = vpop.f32.mrf.mxu0 }
 0x8e4   :  { %v2115_v59 = vpop.f32.mrf.mxu1 }
 0x8e5   :  { %2133 = vmatprep.mubr.msk.bf16.mxu1 %vm277_vm3, %v1237_v9  ;;  %v2128_v42 = vpop.f32.mrf.mxu0 }
 0x8e6   :  { %v1222_v60 = vpop.f32.mrf.mxu1  ;;  %2134 = vmatmul.mubr.msk.bf16.vlgmr.msra.gmra.mxu1 %vm277_vm3, %v1238_v21 }
 0x8e7   :  { %v1311_v62 = vpop.f32.mrf.mxu0 }
 0x8e8   :  { %v2116_v11 = vpop.f32.mrf.mxu1 }
 0x8e9   :  { %v1240_v8 = vpack.c.bf16 %v2116_v11, %v2115_v59 }
 0x8ea   :  { %v1225_v46 = vpop.f32.mrf.mxu1 }
 0x8eb   :  { %v1239_v7 = vpack.c.bf16 %v1225_v46, %v1222_v60 }
 0x8ed   :  { %2137 = vmatprep.mubr.msk.bf16.mxu1 %vm277_vm3, %v1239_v7 }
 0x8ee   :  { %2138 = vmatmul.mubr.msk.bf16.gmra.mxu1 %vm277_vm3, %v1240_v8 }
 0x9a6   :  { %v2135_v24 = vpop.f32.mrf.mxu1 }
 0x9a7   :  { %v1390_v55 = vadd.f32 %v2135_v24, %v2123_v12 }
 0x9a8   :  { %v1381_v33 = vpop.f32.mrf.mxu1 }
 0x9a9   :  { %v1382_v50 = vadd.f32 %v1381_v33, %v1292_v13  ;;  %v2911_v10 = vadd.f32 %v1390_v55, %v2448_v17 }
 0x9aa   :  { %v2136_v52 = vpop.f32.mrf.mxu1 }
 0x9ab   :  { %v2906_v56 = vadd.f32 %v1382_v50, %v2448_v17  ;;  %v1393_v18 = vadd.f32 %v2136_v52, %v2124_v15  ;;  %v1928_v45 = vmul.f32 -1.442695, %v2911_v10 }
 0x9ac   :  { %v1384_v54 = vpop.f32.mrf.mxu1 }
 0x9ad   :  { %v1385_v16 = vadd.f32 %v1384_v54, %v1295_v29  ;;  %1476 = vrot.lane.b32.xlu0 %v2906_v56, %s2374_s12  ;;  %v2921_v23 = vadd.f32 %v1393_v18, %v2448_v17  ;;  %v1926_v1 = vmul.f32 -1.442695, %v2906_v56 }
 0x9ae   :  { %v2139_v26 = vpop.f32.mrf.mxu1 }
 0x9af   :  { %v2914_v61 = vadd.f32 %v1385_v16, %v2448_v17  ;;  %v1406_v34 = vadd.f32 %v2139_v26, %v2127_v19  ;;  %2268 = vpow2.f32 %v1926_v1  ;;  %v1929_v28 = vmul.f32 -1.442695, %v2921_v23 }
 0x9b0   :  { %v1397_v30 = vpop.f32.mrf.mxu1  ;;  %2270 = vpow2.f32 %v1928_v45 }
 0x9b1   :  { %v1398_v31 = vadd.f32 %v1397_v30, %v1308_v53  ;;  %1478 = vrot.lane.b32.xlu1 %v2914_v61, %s2374_s12  ;;  %1480 = vrot.lane.b32.xlu0 %v2911_v10, %s2374_s12  ;;  %v2931_v57 = vadd.f32 %v1406_v34, %v2448_v17  ;;  %v1927_v14 = vmul.f32 -1.442695, %v2914_v61 }
 0x9b2   :  { %v2140_v49 = vpop.f32.mrf.mxu1 }
 0x9b3   :  { %v2924_v36 = vadd.f32 %v1398_v31, %v2448_v17  ;;  %v1409_v5 = vadd.f32 %v2140_v49, %v2128_v42  ;;  %2272 = vpow2.f32 %v1927_v14 }
 0x9b4   :  { %v1400_v58 = vpop.f32.mrf.mxu1  ;;  %2274 = vpow2.f32 %v1929_v28 }
 0x9b5   :  { %v1401_v48 = vadd.f32 %v1400_v58, %v1311_v62  ;;  %1482 = vrot.lane.b32.xlu1 %v2921_v23, %s2374_s12  ;;  %1484 = vrot.lane.b32.xlu0 %v2924_v36, %s2374_s12  ;;  %v2941_v63 = vadd.f32 %v1409_v5, %v2448_v17  ;;  %v1930_v37 = vmul.f32 -1.442695, %v2924_v36 }
 0x9b7   :  { %v2934_v51 = vadd.f32 %v1401_v48, %v2448_v17  ;;  %v1932_v17 = vmul.f32 -1.442695, %v2931_v57  ;;  %2276 = vpow2.f32 %v1930_v37  ;;  %v1933_v2 = vmul.f32 -1.442695, %v2941_v63 }
 0x9b9   :  { %1486 = vrot.lane.b32.xlu1 %v2934_v51, %s2374_s12  ;;  %1488 = vrot.lane.b32.xlu0 %v2931_v57, %s2374_s12  ;;  %v1931_v32 = vmul.f32 -1.442695, %v2934_v51  ;;  %2278 = vpow2.f32 %v1932_v17 }
 0x9bb   :  { %2280 = vpow2.f32 %v1931_v32 }
 0x9bc   :  { %v2269_v20 = vpop.eup %2268  ;;  %2282 = vpow2.f32 %v1933_v2 }
 0x9bd   :  { %1490 = vrot.lane.b32.xlu1 %v2941_v63, %s2374_s12  ;;  %v2271_v3 = vpop.eup %2270  ;;  %v1444_v40 = vadd.f32 1.0, %v2269_v20 }
 0x9be   :  { %v1446_v4 = vadd.f32 1.0, %v2271_v3 }
 0x9bf   :  { %2284 = vrcp.f32 %v1444_v40 }
 0x9c0   :  { %v2273_v38 = vpop.eup %2272  ;;  %2286 = vrcp.f32 %v1446_v4 }
 0x9c1   :  { %v2275_v27 = vpop.eup %2274  ;;  %v1445_v6 = vadd.f32 1.0, %v2273_v38 }
 0x9c2   :  { %v1447_v21 = vadd.f32 1.0, %v2275_v27 }
 0x9c3   :  { %2288 = vrcp.f32 %v1445_v6 }
 0x9c4   :  { %v2277_v9 = vpop.eup %2276  ;;  %2290 = vrcp.f32 %v1447_v21 }
 0x9c5   :  { %v1448_v60 = vadd.f32 1.0, %v2277_v9 }
 0x9c6   :  { %v2279_v59 = vpop.eup %2278 }
 0x9c7   :  { %v1450_v46 = vadd.f32 1.0, %v2279_v59  ;;  %2292 = vrcp.f32 %v1448_v60 }
 0x9c8   :  { %v2281_v11 = vpop.eup %2280 }
 0x9c9   :  { %v1449_v7 = vadd.f32 1.0, %v2281_v11  ;;  %v2283_v8 = vpop.eup %2282  ;;  %2294 = vrcp.f32 %v1450_v46 }
 0x9ca   :  { %v1451_v12 = vadd.f32 1.0, %v2283_v8 }
 0x9cb   :  { %2296 = vrcp.f32 %v1449_v7 }
 0x9cc   :  { %v2953_v13 = vpop.eup %2284  ;;  %2298 = vrcp.f32 %v1451_v12 }
 0x9cd   :  { %v2956_v24 = vpop.eup %2286  ;;  %v1556_v11 = vsub.f32 1.0, %v2953_v13  ;;  %v1604_v8 = vmul.f32 %v2953_v13, %v2871_v0 }
 0x9d0   :  { %v2959_v19 = vpop.eup %2288 }
 0x9d1   :  { %v2963_v53 = vpop.eup %2290  ;;  %v1557_v12 = vsub.f32 1.0, %v2959_v19 }
 0x9d2   :  { %v1607_v0 = vmul.f32 %v2963_v53, %v2861_v41 }
 0x9d4   :  { %v2967_v54 = vpop.eup %2292 }
 0x9d6   :  { %v2971_v30 = vpop.eup %2294 }
 0x9d8   :  { %v2975_v31 = vpop.eup %2296 }
 0x9d9   :  { %v2981_v48 = vpop.eup %2298 }
 0xa1f   :  { %v1477_v15 = vpop.permute.xlu0 %1476 }
 0xa20   :  { %v1500_v29 = vmul.f32 %v2953_v13, %v1477_v15 }
 0xa22   :  { %1516 = vrot.lane.b32.xlu0 %v1500_v29, %s2375_s13  ;;  %v1558_v29 = vsub.f32 1.0, %v2956_v24 }
 0xa23   :  { %v1479_v33 = vpop.permute.xlu1 %1478  ;;  %v1481_v50 = vpop.permute.xlu0 %1480 }
 0xa24   :  { %v1501_v52 = vmul.f32 %v2959_v19, %v1479_v33  ;;  %v1502_v55 = vmul.f32 %v2956_v24, %v1481_v50  ;;  %v1605_v50 = vmul.f32 %v2959_v19, %v2873_v44 }
 0xa26   :  { %1518 = vrot.lane.b32.xlu1 %v1501_v52, %s2375_s13  ;;  %1520 = vrot.lane.b32.xlu0 %v1502_v55, %s2375_s13 }
 0xa27   :  { %v1483_v16 = vpop.permute.xlu1 %1482  ;;  %v1485_v26 = vpop.permute.xlu0 %1484 }
 0xa28   :  { %v1503_v18 = vmul.f32 %v2963_v53, %v1483_v16  ;;  %v1504_v42 = vmul.f32 %v2967_v54, %v1485_v26 }
 0xa2a   :  { %1522 = vrot.lane.b32.xlu1 %v1503_v18, %s2375_s13  ;;  %1524 = vrot.lane.b32.xlu0 %v1504_v42, %s2375_s13  ;;  %v1606_v18 = vmul.f32 %v2956_v24, %v2859_v39  ;;  %v1559_v42 = vsub.f32 1.0, %v2963_v53  ;;  %v1561_v39 = vsub.f32 1.0, %v2975_v31  ;;  %v1562_v53 = vsub.f32 1.0, %v2971_v30 }
 0xa2b   :  { %v1487_v49 = vpop.permute.xlu1 %1486  ;;  %v1489_v34 = vpop.permute.xlu0 %1488 }
 0xa2c   :  { %v1505_v62 = vmul.f32 %v2975_v31, %v1487_v49  ;;  %v1506_v58 = vmul.f32 %v2971_v30, %v1489_v34  ;;  %v1560_v49 = vsub.f32 1.0, %v2967_v54 }
 0xa2e   :  { %1526 = vrot.lane.b32.xlu1 %v1505_v62, %s2375_s13  ;;  %1528 = vrot.lane.b32.xlu0 %v1506_v58, %s2375_s13 }
 0xa2f   :  { %v1491_v5 = vpop.permute.xlu1 %1490 }
 0xa30   :  { %v1507_v1 = vmul.f32 %v2981_v48, %v1491_v5 }
 0xa32   :  { %1530 = vrot.lane.b32.xlu1 %v1507_v1, %s2375_s13 }
 0xa94   :  { %v1517_v45 = vpop.permute.xlu0 %1516 }
 0xa95   :  { %v1540_v14 = vadd.f32 %v1517_v45, %v2906_v56  ;;  %v1608_v45 = vmul.f32 %v2967_v54, %v2846_v43  ;;  %v1610_v43 = vmul.f32 %v2971_v30, %v2834_v35  ;;  %v1563_v54 = vsub.f32 1.0, %v2981_v48 }
 0xa97   :  { %2300 = vtanh.f32 %v1540_v14  ;;  %v1609_v14 = vmul.f32 %v2975_v31, %v2848_v22  ;;  %v1611_v22 = vmul.f32 %v2981_v48, %v2836_v47 }
 0xa98   :  { %v1519_v28 = vpop.permute.xlu1 %1518  ;;  %v1521_v37 = vpop.permute.xlu0 %1520 }
 0xa99   :  { %v1541_v17 = vadd.f32 %v1519_v28, %v2914_v61  ;;  %v1542_v32 = vadd.f32 %v1521_v37, %v2911_v10 }
 0xa9b   :  { %2302 = vtanh.f32 %v1541_v17 }
 0xa9c   :  { %2304 = vtanh.f32 %v1542_v32  ;;  %v1523_v2 = vpop.permute.xlu1 %1522  ;;  %v1525_v20 = vpop.permute.xlu0 %1524 }
 0xa9d   :  { %v1543_v3 = vadd.f32 %v1523_v2, %v2921_v23  ;;  %v1544_v40 = vadd.f32 %v1525_v20, %v2924_v36 }
 0xa9f   :  { %2306 = vtanh.f32 %v1543_v3 }
 0xaa0   :  { %2308 = vtanh.f32 %v1544_v40  ;;  %v1527_v38 = vpop.permute.xlu1 %1526  ;;  %v1529_v4 = vpop.permute.xlu0 %1528 }
 0xaa1   :  { %v1545_v56 = vadd.f32 %v1527_v38, %v2934_v51  ;;  %v1546_v27 = vadd.f32 %v1529_v4, %v2931_v57  ;;  %v2170_v51 = vld [vmem:[%s3126_s5 + $0x8] sm:$0xff]  }
 0xaa2   :  { %2141 = vmatprep.subr.bf16.mxu0 %v2170_v51 }
 0xaa3   :  { %2310 = vtanh.f32 %v1545_v56  ;;  %2142 = vmatpush3.bf16.msra.mxu0 %v2170_v51 }
 0xaa4   :  { %v2301_v61 = vpop.eup %2300  ;;  %2312 = vtanh.f32 %v1546_v27  ;;  %v1531_v10 = vpop.permute.xlu1 %1530 }
 0xaa5   :  { %v1547_v6 = vadd.f32 %v1531_v10, %v2941_v63  ;;  %1572 = vrot.lane.b32.xlu0 %v2301_v61, %s2376_s14  ;;  %v2171_v63 = vld [vmem:[%s3126_s5] sm:$0xff]  }
 0xaa6   :  { %2143 = vmatprep.subr.bf16.mxu0 %v2171_v63 }
 0xaa7   :  { %2314 = vtanh.f32 %v1547_v6  ;;  %2144 = vmatpush3.bf16.msra.mxu0 %v2171_v63 }
 0xaa8   :  { %v2303_v23 = vpop.eup %2302 }
 0xaa9   :  { %v2305_v9 = vpop.eup %2304  ;;  %1574 = vrot.lane.b32.xlu1 %v2303_v23, %s2376_s14 }
 0xaaa   :  { %1576 = vrot.lane.b32.xlu0 %v2305_v9, %s2376_s14 }
 0xaac   :  { %v2307_v36 = vpop.eup %2306 }
 0xaad   :  { %v2309_v21 = vpop.eup %2308  ;;  %1578 = vrot.lane.b32.xlu1 %v2307_v36, %s2376_s14 }
 0xaae   :  { %1580 = vrot.lane.b32.xlu0 %v2309_v21, %s2376_s14 }
 0xab0   :  { %v2311_v57 = vpop.eup %2310 }
 0xab1   :  { %v2313_v59 = vpop.eup %2312  ;;  %1582 = vrot.lane.b32.xlu1 %v2311_v57, %s2376_s14 }
 0xab2   :  { %1584 = vrot.lane.b32.xlu0 %v2313_v59, %s2376_s14 }
 0xab4   :  { %v2315_v60 = vpop.eup %2314 }
 0xab5   :  { %1586 = vrot.lane.b32.xlu1 %v2315_v60, %s2376_s14 }
 0xb17   :  { %v1573_v46 = vpop.permute.xlu0 %1572 }
 0xb18   :  { %v1596_v7 = vmul.f32 %v1573_v46, %v1556_v11 }
 0xb1a   :  { %v1612_v33 = vadd.f32 %v1604_v8, %v1596_v7 }
 0xb1b   :  { %v1575_v15 = vpop.permute.xlu1 %1574 }
 0xb1c   :  { %v1597_v52 = vmul.f32 %v1575_v15, %v1557_v12  ;;  %v1577_v55 = vpop.permute.xlu0 %1576  ;;  %v1620_v34 = vmax.f32 %v1612_v33, 0.0 }
 0xb1d   :  { %v1598_v16 = vmul.f32 %v1577_v55, %v1558_v29 }
 0xb1e   :  { %v1613_v26 = vadd.f32 %v1605_v50, %v1597_v52 }
 0xb1f   :  { %v1579_v13 = vpop.permute.xlu1 %1578  ;;  %v1614_v58 = vadd.f32 %v1606_v18, %v1598_v16 }
 0xb20   :  { %v1621_v62 = vmax.f32 %v1613_v26, 0.0  ;;  %v1599_v5 = vmul.f32 %v1579_v13, %v1559_v42  ;;  %v1581_v44 = vpop.permute.xlu0 %1580 }
 0xb21   :  { %v1600_v19 = vmul.f32 %v1581_v44, %v1560_v49  ;;  %v1622_v28 = vmax.f32 %v1614_v58, 0.0 }
 0xb22   :  { %v1615_v1 = vadd.f32 %v1607_v0, %v1599_v5  ;;  %v1628_v24 = vpack.c.bf16 %v1621_v62, %v1620_v34 }
 0xb23   :  { %v1583_v41 = vpop.permute.xlu1 %1582  ;;  %v1616_v17 = vadd.f32 %v1608_v45, %v1600_v19 }
 0xb24   :  { %v1623_v37 = vmax.f32 %v1615_v1, 0.0  ;;  %v1601_v32 = vmul.f32 %v1583_v41, %v1561_v39  ;;  %v1585_v2 = vpop.permute.xlu0 %1584  ;;  %1640 = vrot.lane.b32.xlu0 %v1628_v24, %s2376_s14 }
 0xb25   :  { %v1602_v20 = vmul.f32 %v1585_v2, %v1562_v53  ;;  %v1624_v38 = vmax.f32 %v1616_v17, 0.0 }
 0xb26   :  { %v1617_v3 = vadd.f32 %v1609_v14, %v1601_v32  ;;  %v1629_v40 = vpack.c.bf16 %v1623_v37, %v1622_v28 }
 0xb27   :  { %v1587_v31 = vpop.permute.xlu1 %1586  ;;  %v1618_v56 = vadd.f32 %v1610_v43, %v1602_v20 }
 0xb28   :  { %v1625_v4 = vmax.f32 %v1617_v3, 0.0  ;;  %v1603_v27 = vmul.f32 %v1587_v31, %v1563_v54  ;;  %1642 = vrot.lane.b32.xlu1 %v1629_v40, %s2376_s14 }
 0xb29   :  { %v1626_v6 = vmax.f32 %v1618_v56, 0.0 }
 0xb2a   :  { %v1619_v61 = vadd.f32 %v1611_v22, %v1603_v27  ;;  %v1630_v10 = vpack.c.bf16 %v1625_v4, %v1624_v38 }
 0xb2c   :  { %v1627_v23 = vmax.f32 %v1619_v61, 0.0  ;;  %1644 = vrot.lane.b32.xlu0 %v1630_v10, %s2376_s14 }
 0xb2e   :  { %v1631_v35 = vpack.c.bf16 %v1627_v23, %v1626_v6 }
 0xb30   :  { %1646 = vrot.lane.b32.xlu1 %v1631_v35, %s2376_s14  ;;  %1661 = vrot.lane.b32.xlu0 %v2474_v25, %s2376_s14 }
 0xb96   :  { %v1641_v47 = vpop.permute.xlu0 %1640 }
 0xb97   :  { %2145 = vmatprep.mubr.msk.bf16.mxu0 %vm277_vm3, %v1641_v47 }
 0xb9a   :  { %v1643_v30 = vpop.permute.xlu1 %1642 }
 0xb9b   :  { %2146 = vmatmul.mubr.msk.bf16.vlgmr.msra.gmra.mxu0 %vm277_vm3, %v1643_v30 }
 0xb9e   :  { %v1645_v48 = vpop.permute.xlu0 %1644 }
 0xb9f   :  { %2149 = vmatprep.mubr.msk.bf16.mxu0 %vm277_vm3, %v1645_v48 }
 0xba2   :  { %v1647_v9 = vpop.permute.xlu1 %1646  ;;  %v1662_v36 = vpop.permute.xlu0 %1661 }
 0xba3   :  { %2150 = vmatmul.mubr.msk.bf16.gmra.mxu0 %vm277_vm3, %v1647_v9 }
 0xc5b   :  { %v2147_v21 = vpop.f32.mrf.mxu0 }
 0xc5c   :  { %v1719_v57 = vadd.f32 %v2147_v21, %v1662_v36 }
 0xc5d   :  { %v1710_v51 = vpop.f32.mrf.mxu0 }
 0xc5e   :  { %v1711_v63 = vadd.f32 %v1710_v51, %v1662_v36  ;;  %v1747_v59 = vsel %vm69_vm1, %v1719_v57, -inf }
 0xc5f   :  { %v2148_v25 = vpop.f32.mrf.mxu0  ;;  %1748 = vmax.xlane.f32.xlu0 %v1747_v59 }
 0xc60   :  { %v1722_v60 = vadd.f32 %v2148_v25, %v1662_v36  ;;  %v1741_v11 = vsel %vm69_vm1, %v1711_v63, -inf }
 0xc61   :  { %v1713_v46 = vpop.f32.mrf.mxu0  ;;  %1742 = vmax.xlane.f32.xlu1 %v1741_v11 }
 0xc62   :  { %v1714_v7 = vadd.f32 %v1713_v46, %v1662_v36  ;;  %v1750_v15 = vsel %vm69_vm1, %v1722_v60, -inf }
 0xc63   :  { %v2151_v8 = vpop.f32.mrf.mxu0 }
 0xc64   :  { %v1744_v12 = vsel %vm69_vm1, %v1714_v7, -inf  ;;  %v1735_v52 = vadd.f32 %v2151_v8, %v1662_v36 }
 0xc65   :  { %v1726_v29 = vpop.f32.mrf.mxu0  ;;  %1745 = vmax.xlane.f32.xlu0 %v1744_v12  ;;  %1751 = vmax.xlane.f32.xlu1 %v1750_v15 }
 0xc66   :  { %v1727_v33 = vadd.f32 %v1726_v29, %v1662_v36  ;;  %v1759_v42 = vsel %vm69_vm1, %v1735_v52, -inf }
 0xc67   :  { %v2152_v50 = vpop.f32.mrf.mxu0 }
 0xc68   :  { %v1753_v55 = vsel %vm69_vm1, %v1727_v33, -inf  ;;  %v1738_v18 = vadd.f32 %v2152_v50, %v1662_v36 }
 0xc69   :  { %v1729_v16 = vpop.f32.mrf.mxu0  ;;  %1754 = vmax.xlane.f32.xlu0 %v1753_v55 }
 0xc6a   :  { %v1730_v26 = vadd.f32 %v1729_v16, %v1662_v36  ;;  %v1762_v13 = vsel %vm69_vm1, %v1738_v18, -inf }
 0xc6c   :  { %v1756_v0 = vsel %vm69_vm1, %v1730_v26, -inf }
 0xc6d   :  { %1760 = vmax.xlane.f32.xlu0 %v1759_v42  ;;  %1757 = vmax.xlane.f32.xlu1 %v1756_v0 }
 0xc71   :  { %1763 = vmax.xlane.f32.xlu1 %v1762_v13 }
 0xce8   :  { %v1749_v49 = vpop.xlane.xlu0 %1748 }
 0xce9   :  { %v3049_v34 = vsub.f32 %v1719_v57, %v1749_v49 }
 0xcea   :  { %v1743_v62 = vpop.xlane.xlu1 %1742 }
 0xceb   :  { %v1777_v58 = vmul.f32 1.442695, %v3049_v34  ;;  %v3052_v5 = vsub.f32 %v1711_v63, %v1743_v62 }
 0xced   :  { %2316 = vpow2.f32 %v1777_v58  ;;  %v1773_v44 = vmul.f32 1.442695, %v3052_v5 }
 0xcee   :  { %v1746_v19 = vpop.xlane.xlu0 %1745  ;;  %v1752_v1 = vpop.xlane.xlu1 %1751 }
 0xcef   :  { %2318 = vpow2.f32 %v1773_v44  ;;  %v3055_v45 = vsub.f32 %v1714_v7, %v1746_v19  ;;  %v3057_v39 = vsub.f32 %v1722_v60, %v1752_v1 }
 0xcf1   :  { %v1779_v24 = vmul.f32 1.442695, %v3057_v39  ;;  %v1775_v14 = vmul.f32 1.442695, %v3055_v45 }
 0xcf2   :  { %v1755_v41 = vpop.xlane.xlu0 %1754 }
 0xcf3   :  { %v3061_v53 = vsub.f32 %v1727_v33, %v1755_v41  ;;  %2320 = vpow2.f32 %v1779_v24 }
 0xcf4   :  { %2322 = vpow2.f32 %v1775_v14 }
 0xcf5   :  { %v1781_v28 = vmul.f32 1.442695, %v3061_v53 }
 0xcf6   :  { %v1761_v37 = vpop.xlane.xlu0 %1760  ;;  %v1758_v17 = vpop.xlane.xlu1 %1757 }
 0xcf7   :  { %2324 = vpow2.f32 %v1781_v28  ;;  %v3064_v32 = vsub.f32 %v1735_v52, %v1761_v37  ;;  %v3066_v2 = vsub.f32 %v1730_v26, %v1758_v17 }
 0xcf9   :  { %v1785_v20 = vmul.f32 1.442695, %v3064_v32  ;;  %v1783_v3 = vmul.f32 1.442695, %v3066_v2 }
 0xcfa   :  { %v2317_v43 = vpop.eup %2316  ;;  %v1764_v54 = vpop.xlane.xlu1 %1763 }
 0xcfb   :  { %2326 = vpow2.f32 %v1785_v20  ;;  %v3070_v40 = vsub.f32 %v1738_v18, %v1764_v54  ;;  %v1795_v22 = vsel %vm69_vm1, %v2317_v43, 0.0 }
 0xcfc   :  { %v2319_v31 = vpop.eup %2318  ;;  %2328 = vpow2.f32 %v1783_v3  ;;  %1796 = vadd.xlane.f32.xlu0 %v1795_v22 }
 0xcfd   :  { %v1787_v38 = vmul.f32 1.442695, %v3070_v40  ;;  %v1789_v4 = vsel %vm69_vm1, %v2319_v31, 0.0 }
 0xcff   :  { %2330 = vpow2.f32 %v1787_v38 }
 0xd00   :  { %1790 = vadd.xlane.f32.xlu0 %v1789_v4  ;;  %v2321_v56 = vpop.eup %2320 }
 0xd01   :  { %v1798_v27 = vsel %vm69_vm1, %v2321_v56, 0.0  ;;  %v2323_v61 = vpop.eup %2322 }
 0xd02   :  { %1799 = vadd.xlane.f32.xlu1 %v1798_v27  ;;  %v1792_v23 = vsel %vm69_vm1, %v2323_v61, 0.0 }
 0xd04   :  { %v2325_v10 = vpop.eup %2324 }
 0xd05   :  { %v1801_v6 = vsel %vm69_vm1, %v2325_v10, 0.0 }
 0xd06   :  { %1802 = vadd.xlane.f32.xlu0 %v1801_v6  ;;  %1793 = vadd.xlane.f32.xlu1 %v1792_v23 }
 0xd08   :  { %v2327_v35 = vpop.eup %2326 }
 0xd09   :  { %v2329_v47 = vpop.eup %2328  ;;  %v1807_v30 = vsel %vm69_vm1, %v2327_v35, 0.0 }
 0xd0a   :  { %1808 = vadd.xlane.f32.xlu0 %v1807_v30  ;;  %v1804_v48 = vsel %vm69_vm1, %v2329_v47, 0.0 }
 0xd0b   :  { %1805 = vadd.xlane.f32.xlu1 %v1804_v48 }
 0xd0c   :  { %v2331_v9 = vpop.eup %2330 }
 0xd0d   :  { %v1810_v36 = vsel %vm69_vm1, %v2331_v9, 0.0 }
 0xd0f   :  { %1811 = vadd.xlane.f32.xlu1 %v1810_v36 }
 0xd85   :  { %v1797_v21 = vpop.xlane.xlu0 %1796 }
 0xd86   :  { %2332 = vlog2.f32 %v1797_v21 }
 0xd89   :  { %v1791_v57 = vpop.xlane.xlu0 %1790 }
 0xd8a   :  { %2334 = vlog2.f32 %v1791_v57 }
 0xd8b   :  { %v1800_v51 = vpop.xlane.xlu1 %1799 }
 0xd8c   :  { %2336 = vlog2.f32 %v1800_v51 }
 0xd8f   :  { %v1803_v63 = vpop.xlane.xlu0 %1802  ;;  %v1794_v59 = vpop.xlane.xlu1 %1793 }
 0xd90   :  { %2338 = vlog2.f32 %v1803_v63 }
 0xd91   :  { %2340 = vlog2.f32 %v1794_v59 }
 0xd93   :  { %v2333_v25 = vpop.eup %2332  ;;  %v1809_v60 = vpop.xlane.xlu0 %1808 }
 0xd94   :  { %v1818_v11 = vmul.f32 0.6931472, %v2333_v25  ;;  %2342 = vlog2.f32 %v1809_v60  ;;  %v1806_v46 = vpop.xlane.xlu1 %1805 }
 0xd95   :  { %2344 = vlog2.f32 %v1806_v46 }
 0xd96   :  { %v1831_v7 = vsub.f32 %v3049_v34, %v1818_v11 }
 0xd97   :  { %v2335_v8 = vpop.eup %2334 }
 0xd98   :  { %1839 = vst.msk [vmem:[%s3128_s7 + $0x10] sm:$0xff] %vm69_vm1, %v1831_v7  ;;  %v1814_v12 = vmul.f32 0.6931472, %v2335_v8  ;;  %v1812_v15 = vpop.xlane.xlu1 %1811 }
 0xd99   :  { %2346 = vlog2.f32 %v1812_v15  ;;  %v2337_v29 = vpop.eup %2336 }
 0xd9a   :  { %v1829_v33 = vsub.f32 %v3052_v5, %v1814_v12  ;;  %v1820_v50 = vmul.f32 0.6931472, %v2337_v29 }
 0xd9c   :  { %1837 = vst.msk [vmem:[%s3128_s7] sm:$0xff] %vm69_vm1, %v1829_v33  ;;  %v1832_v55 = vsub.f32 %v3057_v39, %v1820_v50 }
 0xd9d   :  { %v2339_v52 = vpop.eup %2338 }
 0xd9e   :  { %v2341_v16 = vpop.eup %2340  ;;  %v1822_v26 = vmul.f32 0.6931472, %v2339_v52  ;;  %1840 = vst.msk [vmem:[%s3128_s7 + $0x18] sm:$0xff] %vm69_vm1, %v1832_v55 }
 0xd9f   :  { %v1816_v18 = vmul.f32 0.6931472, %v2341_v16 }
 0xda0   :  { %v1833_v42 = vsub.f32 %v3061_v53, %v1822_v26 }
 0xda1   :  { %v2343_v0 = vpop.eup %2342  ;;  %v1830_v13 = vsub.f32 %v3055_v45, %v1816_v18 }
 0xda2   :  { %v2345_v49 = vpop.eup %2344  ;;  %1841 = vst.msk [vmem:[%s3128_s7 + $0x20] sm:$0xff] %vm69_vm1, %v1833_v42  ;;  %v1826_v34 = vmul.f32 0.6931472, %v2343_v0 }
 0xda3   :  { %1838 = vst.msk [vmem:[%s3128_s7 + $0x8] sm:$0xff] %vm69_vm1, %v1830_v13  ;;  %v1824_v62 = vmul.f32 0.6931472, %v2345_v49 }
 0xda4   :  { %v1835_v58 = vsub.f32 %v3064_v32, %v1826_v34 }
 0xda5   :  { %v1834_v5 = vsub.f32 %v3066_v2, %v1824_v62 }
 0xda6   :  { %v2347_v44 = vpop.eup %2346  ;;  %1843 = vst.msk [vmem:[%s3128_s7 + $0x30] sm:$0xff] %vm69_vm1, %v1835_v58 }
 0xda7   :  { %1842 = vst.msk [vmem:[%s3128_s7 + $0x28] sm:$0xff] %vm69_vm1, %v1834_v5  ;;  %v1828_v19 = vmul.f32 0.6931472, %v2347_v44 }
 0xda9   :  { %v1836_v1 = vsub.f32 %v3070_v40, %v1828_v19 }
 0xdab   :  { %1844 = vst.msk [vmem:[%s3128_s7 + $0x38] sm:$0xff] %vm69_vm1, %v1836_v1 }
 0xdac   :  { %1849 = vsyncpa [#allocation3], 1 }

</bundles_post_ra>
